<compile_context>
chip_gen: v6e
topology: v6e:2x2x1
jax: 0.10.0
libtpu: 0.0.40
codegen_flags: <defaults>
</compile_context>

<pallas_src>
import functools

import jax
import jax.numpy as jnp
from jax.experimental import pallas as pl
from jax.experimental.pallas import tpu as pltpu

KSIZE = 3            # kernel_size default of the module
PAD = KSIZE // 2     # = 1


def _sepconv_kernel(xm_ref, xt_ref, xb_ref, dww_ref, pww_ref, bias_ref,
                    o_ref, xpad_ref):
    """Fused depthwise 3x3 + folded BN + pointwise 1x1 for one (batch, H-tile).

    xm_ref   : (1, TH, W, C)     tile body (NHWC)
    xt_ref   : (1, 1,  W, C)     row directly above the tile (zeros at image top)
    xb_ref   : (1, 1,  W, C)     row directly below the tile (zeros at image bottom)
    dww_ref  : (3, 3, C)         depthwise weights (per-channel taps)
    pww_ref  : (C, Cout)         pointwise weights with BN scale folded in
    bias_ref : (1, Cout)         BN shift pushed through the pointwise conv
    o_ref    : (1, TH, W, Cout)  output tile
    xpad_ref : (TH+2, W+2, C)    VMEM scratch: zero-padded tile assembled here
    """
    TH = xm_ref.shape[1]
    W = xm_ref.shape[2]
    C = xm_ref.shape[3]

    # ---- assemble the zero-padded tile in VMEM (replaces the wrapper jnp.pad).
    # Re-zeroed every step (no reliance on "first grid step" init, which is not
    # well-defined per-core under parallel dimension_semantics).
    xpad_ref[...] = jnp.zeros_like(xpad_ref)                 # pad cols/rows
    xpad_ref[0, pl.ds(PAD, W), :] = xt_ref[0, 0]             # top halo row
    xpad_ref[TH + 1, pl.ds(PAD, W), :] = xb_ref[0, 0]        # bottom halo row
    xpad_ref[pl.ds(PAD, TH), pl.ds(PAD, W), :] = xm_ref[0]   # tile body

    xpad = xpad_ref[...]        # (TH+2, W+2, C)
    dww = dww_ref[...]          # (3, 3, C)

    # ---- depthwise 3x3 (stride 1, dilation 1): shifted-window MACs on the VPU,
    # channels stay on lanes.  BN is NOT applied here; it is folded into the
    # pointwise weights/bias.
    # TODO(synk): the kj=1,2 slices are sublane-misaligned; for VALU-bound
    #             shapes move the W shift onto pltpu.roll (XLU slot) instead.
    acc = jnp.zeros((TH, W, C), jnp.float32)
    for ki in range(KSIZE):
        for kj in range(KSIZE):
            acc = acc + xpad[ki:ki + TH, kj:kj + W, :] * dww[ki, kj, :]

    # ---- pointwise 1x1 (+ folded BN) == (TH*W, C) @ (C, Cout) on the MXU.
    # Inputs are cast to pww's dtype (bf16 by default) with f32 accumulation.
    # W % 8 == 0 keeps the flatten/unflatten a layout no-op.
    y = acc.reshape(TH * W, C).astype(pww_ref.dtype)
    out = jnp.dot(y, pww_ref[...], preferred_element_type=jnp.float32)
    out = out + bias_ref[...]
    o_ref[0] = out.reshape(TH, W, -1).astype(o_ref.dtype)


def _pick_tile_h(H, W, C, itemsize, target_bytes=1 << 19):
    """Largest divisor of H whose padded (TH+2, W+2, C) tile fits ~512 KB."""
    best = 1
    for th in range(1, H + 1):
        if H % th == 0 and (th + 2) * (W + 2 * PAD) * C * itemsize <= target_bytes:
            best = th
    return best


@functools.partial(jax.jit, static_argnames=("mxu_dtype", "tile_h"))
def separable_conv2d(x_nchw, dw_weight, bn_gamma, bn_beta, bn_mean, bn_var,
                     pw_weight, eps=1e-5, *, mxu_dtype=jnp.bfloat16,
                     tile_h=None):
    """SeparableConv2d forward (module defaults: k=3, stride=1, dilation=1, no bias).

    x_nchw    : (N, C, H, W)        input, PyTorch layout
    dw_weight : (C, 1, 3, 3)        depthwise conv weight (PyTorch layout)
    bn_*      : (C,)                BatchNorm2d params / running stats (eval mode)
    pw_weight : (Cout, C, 1, 1)     pointwise conv weight (PyTorch layout)
    returns   : (N, Cout, H, W)
    """
    N, C, H, W = x_nchw.shape
    Cout = pw_weight.shape[0]

    if tile_h is None or H % tile_h != 0:
        tile_h = _pick_tile_h(H, W, C, x_nchw.dtype.itemsize)
    th = tile_h
    n_h = H // th

    # ---- glue (plain JAX): layout + parameter folding + tiny halo gather ----
    x = jnp.transpose(x_nchw, (0, 2, 3, 1))                    # NHWC
    zrow = jnp.zeros((N, 1, W, C), x.dtype)
    if n_h > 1:
        # Row above tile t (t>0) is image row t*th-1; row below tile t
        # (t<n_h-1) is image row (t+1)*th.  These slabs are ~2/th of the input,
        # vs. the full extra HBM pass the old jnp.pad cost.
        top = jnp.concatenate([zrow, x[:, th - 1:H - 1:th]], axis=1)
        bot = jnp.concatenate([x[:, th::th], zrow], axis=1)
    else:
        top = zrow
        bot = zrow

    dww = jnp.transpose(dw_weight[:, 0, :, :], (1, 2, 0))      # (3, 3, C)
    scale = bn_gamma / jnp.sqrt(bn_var + eps)                  # (C,)
    shift = bn_beta - bn_mean * scale                          # (C,)
    pww = jnp.transpose(pw_weight[:, :, 0, 0], (1, 0))         # (C, Cout)
    pww_folded = (scale[:, None] * pww).astype(mxu_dtype)      # BN scale folded
    bias = (shift @ pww).reshape(1, Cout).astype(jnp.float32)  # BN shift folded

    out_nhwc = pl.pallas_call(
        _sepconv_kernel,
        out_shape=jax.ShapeDtypeStruct((N, H, W, Cout), x_nchw.dtype),
        grid_spec=pltpu.PrefetchScalarGridSpec(
            num_scalar_prefetch=0,
            grid=(N, n_h),
            in_specs=[
                pl.BlockSpec((1, th, W, C), lambda n, t: (n, t, 0, 0)),
                pl.BlockSpec((1, 1, W, C), lambda n, t: (n, t, 0, 0)),
                pl.BlockSpec((1, 1, W, C), lambda n, t: (n, t, 0, 0)),
                pl.BlockSpec((KSIZE, KSIZE, C), lambda n, t: (0, 0, 0)),
                pl.BlockSpec((C, Cout), lambda n, t: (0, 0)),
                pl.BlockSpec((1, Cout), lambda n, t: (0, 0)),
            ],
            out_specs=pl.BlockSpec((1, th, W, Cout), lambda n, t: (n, t, 0, 0)),
            scratch_shapes=[pltpu.VMEM((th + 2, W + 2 * PAD, C), x.dtype)],
        ),
        compiler_params=pltpu.CompilerParams(
            dimension_semantics=("parallel", "parallel")),
    )(x, top, bot, dww, pww_folded, bias)

    return jnp.transpose(out_nhwc, (0, 3, 1, 2))               # back to NCHW


def _reference(x_nchw, dw_weight, bn_gamma, bn_beta, bn_mean, bn_var,
               pw_weight, eps=1e-5):
    """Plain-JAX reference (NCHW) for the correctness check."""
    C = x_nchw.shape[1]
    y = jax.lax.conv_general_dilated(
        x_nchw, dw_weight, window_strides=(1, 1), padding=((1, 1), (1, 1)),
        dimension_numbers=("NCHW", "OIHW", "NCHW"), feature_group_count=C)
    scale = bn_gamma / jnp.sqrt(bn_var + eps)
    y = y * scale[None, :, None, None] + (bn_beta - bn_mean * scale)[None, :, None, None]
    y = jax.lax.conv_general_dilated(
        y, pw_weight, window_strides=(1, 1), padding="VALID",
        dimension_numbers=("NCHW", "OIHW", "NCHW"))
    return y


if __name__ == "__main__":
    key = jax.random.PRNGKey(0)
    k_x, k_dw, k_pw, k_g, k_b, k_m, k_v = jax.random.split(key, 7)

    N, C, H, W = 2, 4, 16, 16
    Cout = 8

    x = jax.random.normal(k_x, (N, C, H, W), jnp.float32)
    # Parameter shapes follow the PyTorch module:
    #   conv1.weight     : (C, 1, 3, 3)   (groups=C, bias=False)
    #   bn.{weight,bias} : (C,), running_{mean,var}: (C,)
    #   pointwise.weight : (Cout, C, 1, 1) (bias=False)
    dw_weight = 0.1 * jax.random.normal(k_dw, (C, 1, 3, 3), jnp.float32)
    pw_weight = 0.1 * jax.random.normal(k_pw, (Cout, C, 1, 1), jnp.float32)
    bn_gamma = 1.0 + 0.1 * jax.random.normal(k_g, (C,), jnp.float32)
    bn_beta = 0.1 * jax.random.normal(k_b, (C,), jnp.float32)
    bn_mean = 0.1 * jax.random.normal(k_m, (C,), jnp.float32)
    bn_var = jnp.abs(1.0 + 0.1 * jax.random.normal(k_v, (C,), jnp.float32))

    args = (x, dw_weight, bn_gamma, bn_beta, bn_mean, bn_var, pw_weight)

    # Default path: bf16 MXU inputs (fast path on v6e/v7x), auto H tile.
    out_bf16 = separable_conv2d(*args)
    # Exact path: f32 MXU inputs, forced 2 H-tiles per image (exercises halos).
    out_f32 = separable_conv2d(*args, mxu_dtype=jnp.float32, tile_h=8)
    out_bf16, out_f32 = jax.block_until_ready((out_bf16, out_f32))

    ref = _reference(*args)
    assert out_f32.shape == (N, Cout, H, W), out_f32.shape
    assert out_bf16.shape == (N, Cout, H, W), out_bf16.shape
    assert jnp.allclose(out_f32, ref, atol=1e-4, rtol=1e-4), \
        float(jnp.max(jnp.abs(out_f32 - ref)))
    # bf16 MXU inputs (f32 accumulation) cost ~1e-3 absolute at these magnitudes.
    assert jnp.allclose(out_bf16, ref, atol=5e-3, rtol=5e-3), \
        float(jnp.max(jnp.abs(out_bf16 - ref)))

    print("KERNEL_OK")
</pallas_src>

<mosaic_0001>
module attributes {stable_mosaic.version = 11 : i64} {
  func.func @_sepconv_kernel(%arg0: i32, %arg1: i32, %arg2: memref<1x16x16x4xf32, #tpu.memory_space<vmem>>, %arg3: memref<1x1x16x4xf32, #tpu.memory_space<vmem>>, %arg4: memref<1x1x16x4xf32, #tpu.memory_space<vmem>>, %arg5: memref<3x3x4xf32, #tpu.memory_space<vmem>>, %arg6: memref<4x8xbf16, #tpu.memory_space<vmem>>, %arg7: memref<1x8xf32, #tpu.memory_space<vmem>>, %arg8: memref<1x16x16x8xf32, #tpu.memory_space<vmem>>, %arg9: memref<18x18x4xf32, #tpu.memory_space<vmem>>) attributes {dimension_semantics = [#tpu.dimension_semantics<parallel>, #tpu.dimension_semantics<parallel>], iteration_bounds = array<i64: 2, 1>, scalar_prefetch = 0 : i64, scratch_operands = 1 : i64, tpu.core_type = #tpu.core_type<tc>, window_params = [{transform_indices = @transform_0, window_bounds = array<i64: 1, 16, 16, 4>}, {transform_indices = @transform_1, window_bounds = array<i64: 1, 1, 16, 4>}, {transform_indices = @transform_2, window_bounds = array<i64: 1, 1, 16, 4>}, {pipeline_mode = #tpu.pipeline_mode<synchronous>, transform_indices = @transform_3, window_bounds = array<i64: 3, 3, 4>}, {pipeline_mode = #tpu.pipeline_mode<synchronous>, transform_indices = @transform_4, window_bounds = array<i64: 4, 8>}, {pipeline_mode = #tpu.pipeline_mode<synchronous>, transform_indices = @transform_5, window_bounds = array<i64: 1, 8>}, {transform_indices = @transform_6, window_bounds = array<i64: 1, 16, 16, 8>}]} {
    %cst = arith.constant 0.000000e+00 : f32
    %0 = vector.broadcast %cst : f32 to vector<18x18x4xf32>
    %c0 = arith.constant 0 : index
    %c0_0 = arith.constant 0 : index
    %c0_1 = arith.constant 0 : index
    %1 = vector.load %arg9[%c0, %c0_0, %c0_1] : memref<18x18x4xf32, #tpu.memory_space<vmem>>, vector<18x18x4xf32>
    tpu.vector_store %arg9[%c0, %c0_0, %c0_1], %0 {strides = array<i32>} : memref<18x18x4xf32, #tpu.memory_space<vmem>>, vector<18x18x4xf32>,
    %c0_2 = arith.constant 0 : index
    %c0_3 = arith.constant 0 : index
    %c0_4 = arith.constant 0 : index
    %c0_5 = arith.constant 0 : index
    %2 = vector.load %arg3[%c0_2, %c0_3, %c0_4, %c0_5] : memref<1x1x16x4xf32, #tpu.memory_space<vmem>>, vector<1x1x16x4xf32>
    %3 = vector.shape_cast %2 : vector<1x1x16x4xf32> to vector<16x4xf32>
    %c0_6 = arith.constant 0 : index
    %c1 = arith.constant 1 : index
    %c0_7 = arith.constant 0 : index
    %4 = vector.load %arg9[%c0_6, %c1, %c0_7] : memref<18x18x4xf32, #tpu.memory_space<vmem>>, vector<1x16x4xf32>
    %5 = vector.shape_cast %4 : vector<1x16x4xf32> to vector<16x4xf32>
    %6 = vector.shape_cast %3 : vector<16x4xf32> to vector<1x16x4xf32>
    tpu.vector_store %arg9[%c0_6, %c1, %c0_7], %6 {strides = array<i32>} : memref<18x18x4xf32, #tpu.memory_space<vmem>>, vector<1x16x4xf32>,
    %c0_8 = arith.constant 0 : index
    %c0_9 = arith.constant 0 : index
    %c0_10 = arith.constant 0 : index
    %c0_11 = arith.constant 0 : index
    %7 = vector.load %arg4[%c0_8, %c0_9, %c0_10, %c0_11] : memref<1x1x16x4xf32, #tpu.memory_space<vmem>>, vector<1x1x16x4xf32>
    %8 = vector.shape_cast %7 : vector<1x1x16x4xf32> to vector<16x4xf32>
    %c17 = arith.constant 17 : index
    %c1_12 = arith.constant 1 : index
    %c0_13 = arith.constant 0 : index
    %9 = vector.load %arg9[%c17, %c1_12, %c0_13] : memref<18x18x4xf32, #tpu.memory_space<vmem>>, vector<1x16x4xf32>
    %10 = vector.shape_cast %9 : vector<1x16x4xf32> to vector<16x4xf32>
    %11 = vector.shape_cast %8 : vector<16x4xf32> to vector<1x16x4xf32>
    tpu.vector_store %arg9[%c17, %c1_12, %c0_13], %11 {strides = array<i32>} : memref<18x18x4xf32, #tpu.memory_space<vmem>>, vector<1x16x4xf32>,
    %c0_14 = arith.constant 0 : index
    %c0_15 = arith.constant 0 : index
    %c0_16 = arith.constant 0 : index
    %c0_17 = arith.constant 0 : index
    %12 = vector.load %arg2[%c0_14, %c0_15, %c0_16, %c0_17] : memref<1x16x16x4xf32, #tpu.memory_space<vmem>>, vector<1x16x16x4xf32>
    %13 = vector.shape_cast %12 : vector<1x16x16x4xf32> to vector<16x16x4xf32>
    %c1_18 = arith.constant 1 : index
    %c1_19 = arith.constant 1 : index
    %c0_20 = arith.constant 0 : index
    %14 = vector.load %arg9[%c1_18, %c1_19, %c0_20] : memref<18x18x4xf32, #tpu.memory_space<vmem>>, vector<16x16x4xf32>
    tpu.vector_store %arg9[%c1_18, %c1_19, %c0_20], %13 {strides = array<i32>} : memref<18x18x4xf32, #tpu.memory_space<vmem>>, vector<16x16x4xf32>,
    %c0_21 = arith.constant 0 : index
    %c0_22 = arith.constant 0 : index
    %c0_23 = arith.constant 0 : index
    %15 = vector.load %arg9[%c0_21, %c0_22, %c0_23] : memref<18x18x4xf32, #tpu.memory_space<vmem>>, vector<18x18x4xf32>
    %c0_24 = arith.constant 0 : index
    %c0_25 = arith.constant 0 : index
    %c0_26 = arith.constant 0 : index
    %16 = vector.load %arg5[%c0_24, %c0_25, %c0_26] : memref<3x3x4xf32, #tpu.memory_space<vmem>>, vector<3x3x4xf32>
    %cst_27 = arith.constant 0.000000e+00 : f32
    %17 = vector.broadcast %cst_27 : f32 to vector<16x16x4xf32>
    %18 = vector.extract_strided_slice %15 {offsets = [0, 0, 0], sizes = [16, 16, 4], strides = [1, 1, 1]} : vector<18x18x4xf32> to vector<16x16x4xf32>
    %19 = vector.extract_strided_slice %16 {offsets = [0, 0, 0], sizes = [1, 1, 4], strides = [1, 1, 1]} : vector<3x3x4xf32> to vector<1x1x4xf32>
    %20 = vector.shape_cast %19 : vector<1x1x4xf32> to vector<4xf32>
    %21 = vector.shape_cast %20 : vector<4xf32> to vector<1x1x4xf32>
    %22 = vector.broadcast %21 : vector<1x1x4xf32> to vector<16x16x4xf32>
    %23 = arith.mulf %18, %22 : vector<16x16x4xf32>
    %24 = arith.addf %17, %23 : vector<16x16x4xf32>
    %25 = vector.extract_strided_slice %15 {offsets = [0, 1, 0], sizes = [16, 16, 4], strides = [1, 1, 1]} : vector<18x18x4xf32> to vector<16x16x4xf32>
    %26 = vector.extract_strided_slice %16 {offsets = [0, 1, 0], sizes = [1, 1, 4], strides = [1, 1, 1]} : vector<3x3x4xf32> to vector<1x1x4xf32>
    %27 = vector.shape_cast %26 : vector<1x1x4xf32> to vector<4xf32>
    %28 = vector.shape_cast %27 : vector<4xf32> to vector<1x1x4xf32>
    %29 = vector.broadcast %28 : vector<1x1x4xf32> to vector<16x16x4xf32>
    %30 = arith.mulf %25, %29 : vector<16x16x4xf32>
    %31 = arith.addf %24, %30 : vector<16x16x4xf32>
    %32 = vector.extract_strided_slice %15 {offsets = [0, 2, 0], sizes = [16, 16, 4], strides = [1, 1, 1]} : vector<18x18x4xf32> to vector<16x16x4xf32>
    %33 = vector.extract_strided_slice %16 {offsets = [0, 2, 0], sizes = [1, 1, 4], strides = [1, 1, 1]} : vector<3x3x4xf32> to vector<1x1x4xf32>
    %34 = vector.shape_cast %33 : vector<1x1x4xf32> to vector<4xf32>
    %35 = vector.shape_cast %34 : vector<4xf32> to vector<1x1x4xf32>
    %36 = vector.broadcast %35 : vector<1x1x4xf32> to vector<16x16x4xf32>
    %37 = arith.mulf %32, %36 : vector<16x16x4xf32>
    %38 = arith.addf %31, %37 : vector<16x16x4xf32>
    %39 = vector.extract_strided_slice %15 {offsets = [1, 0, 0], sizes = [16, 16, 4], strides = [1, 1, 1]} : vector<18x18x4xf32> to vector<16x16x4xf32>
    %40 = vector.extract_strided_slice %16 {offsets = [1, 0, 0], sizes = [1, 1, 4], strides = [1, 1, 1]} : vector<3x3x4xf32> to vector<1x1x4xf32>
    %41 = vector.shape_cast %40 : vector<1x1x4xf32> to vector<4xf32>
    %42 = vector.shape_cast %41 : vector<4xf32> to vector<1x1x4xf32>
    %43 = vector.broadcast %42 : vector<1x1x4xf32> to vector<16x16x4xf32>
    %44 = arith.mulf %39, %43 : vector<16x16x4xf32>
    %45 = arith.addf %38, %44 : vector<16x16x4xf32>
    %46 = vector.extract_strided_slice %15 {offsets = [1, 1, 0], sizes = [16, 16, 4], strides = [1, 1, 1]} : vector<18x18x4xf32> to vector<16x16x4xf32>
    %47 = vector.extract_strided_slice %16 {offsets = [1, 1, 0], sizes = [1, 1, 4], strides = [1, 1, 1]} : vector<3x3x4xf32> to vector<1x1x4xf32>
    %48 = vector.shape_cast %47 : vector<1x1x4xf32> to vector<4xf32>
    %49 = vector.shape_cast %48 : vector<4xf32> to vector<1x1x4xf32>
    %50 = vector.broadcast %49 : vector<1x1x4xf32> to vector<16x16x4xf32>
    %51 = arith.mulf %46, %50 : vector<16x16x4xf32>
    %52 = arith.addf %45, %51 : vector<16x16x4xf32>
    %53 = vector.extract_strided_slice %15 {offsets = [1, 2, 0], sizes = [16, 16, 4], strides = [1, 1, 1]} : vector<18x18x4xf32> to vector<16x16x4xf32>
    %54 = vector.extract_strided_slice %16 {offsets = [1, 2, 0], sizes = [1, 1, 4], strides = [1, 1, 1]} : vector<3x3x4xf32> to vector<1x1x4xf32>
    %55 = vector.shape_cast %54 : vector<1x1x4xf32> to vector<4xf32>
    %56 = vector.shape_cast %55 : vector<4xf32> to vector<1x1x4xf32>
    %57 = vector.broadcast %56 : vector<1x1x4xf32> to vector<16x16x4xf32>
    %58 = arith.mulf %53, %57 : vector<16x16x4xf32>
    %59 = arith.addf %52, %58 : vector<16x16x4xf32>
    %60 = vector.extract_strided_slice %15 {offsets = [2, 0, 0], sizes = [16, 16, 4], strides = [1, 1, 1]} : vector<18x18x4xf32> to vector<16x16x4xf32>
    %61 = vector.extract_strided_slice %16 {offsets = [2, 0, 0], sizes = [1, 1, 4], strides = [1, 1, 1]} : vector<3x3x4xf32> to vector<1x1x4xf32>
    %62 = vector.shape_cast %61 : vector<1x1x4xf32> to vector<4xf32>
    %63 = vector.shape_cast %62 : vector<4xf32> to vector<1x1x4xf32>
    %64 = vector.broadcast %63 : vector<1x1x4xf32> to vector<16x16x4xf32>
    %65 = arith.mulf %60, %64 : vector<16x16x4xf32>
    %66 = arith.addf %59, %65 : vector<16x16x4xf32>
    %67 = vector.extract_strided_slice %15 {offsets = [2, 1, 0], sizes = [16, 16, 4], strides = [1, 1, 1]} : vector<18x18x4xf32> to vector<16x16x4xf32>
    %68 = vector.extract_strided_slice %16 {offsets = [2, 1, 0], sizes = [1, 1, 4], strides = [1, 1, 1]} : vector<3x3x4xf32> to vector<1x1x4xf32>
    %69 = vector.shape_cast %68 : vector<1x1x4xf32> to vector<4xf32>
    %70 = vector.shape_cast %69 : vector<4xf32> to vector<1x1x4xf32>
    %71 = vector.broadcast %70 : vector<1x1x4xf32> to vector<16x16x4xf32>
    %72 = arith.mulf %67, %71 : vector<16x16x4xf32>
    %73 = arith.addf %66, %72 : vector<16x16x4xf32>
    %74 = vector.extract_strided_slice %15 {offsets = [2, 2, 0], sizes = [16, 16, 4], strides = [1, 1, 1]} : vector<18x18x4xf32> to vector<16x16x4xf32>
    %75 = vector.extract_strided_slice %16 {offsets = [2, 2, 0], sizes = [1, 1, 4], strides = [1, 1, 1]} : vector<3x3x4xf32> to vector<1x1x4xf32>
    %76 = vector.shape_cast %75 : vector<1x1x4xf32> to vector<4xf32>
    %77 = vector.shape_cast %76 : vector<4xf32> to vector<1x1x4xf32>
    %78 = vector.broadcast %77 : vector<1x1x4xf32> to vector<16x16x4xf32>
    %79 = arith.mulf %74, %78 : vector<16x16x4xf32>
    %80 = arith.addf %73, %79 : vector<16x16x4xf32>
    %81 = vector.shape_cast %80 : vector<16x16x4xf32> to vector<256x4xf32>
    %82 = arith.truncf %81 : vector<256x4xf32> to vector<256x4xbf16>
    %c0_28 = arith.constant 0 : index
    %c0_29 = arith.constant 0 : index
    %83 = vector.load %arg6[%c0_28, %c0_29] : memref<4x8xbf16, #tpu.memory_space<vmem>>, vector<4x8xbf16>
    %cst_30 = arith.constant dense<0.000000e+00> : vector<256x8xf32>
    %84 = tpu.matmul %82, %83, %cst_30 {dimension_numbers = #tpu.dot_dimension_numbers<[1], [0], [0], [1], [0, 0, 1, 1], [], []>} : vector<256x4xbf16>, vector<4x8xbf16>, vector<256x8xf32> -> vector<256x8xf32>
    %c0_31 = arith.constant 0 : index
    %c0_32 = arith.constant 0 : index
    %85 = vector.load %arg7[%c0_31, %c0_32] : memref<1x8xf32, #tpu.memory_space<vmem>>, vector<1x8xf32>
    %86 = vector.broadcast %85 : vector<1x8xf32> to vector<256x8xf32>
    %87 = arith.addf %84, %86 : vector<256x8xf32>
    %88 = vector.shape_cast %87 : vector<256x8xf32> to vector<16x16x8xf32>
    %c0_33 = arith.constant 0 : index
    %c0_34 = arith.constant 0 : index
    %c0_35 = arith.constant 0 : index
    %c0_36 = arith.constant 0 : index
    %89 = vector.load %arg8[%c0_33, %c0_34, %c0_35, %c0_36] : memref<1x16x16x8xf32, #tpu.memory_space<vmem>>, vector<1x16x16x8xf32>
    %90 = vector.shape_cast %89 : vector<1x16x16x8xf32> to vector<16x16x8xf32>
    %91 = vector.shape_cast %88 : vector<16x16x8xf32> to vector<1x16x16x8xf32>
    tpu.vector_store %arg8[%c0_33, %c0_34, %c0_35, %c0_36], %91 {strides = array<i32>} : memref<1x16x16x8xf32, #tpu.memory_space<vmem>>, vector<1x16x16x8xf32>,
    return
  }
  func.func @transform_0(%arg0: i32, %arg1: i32) -> (i32, i32, i32, i32) {
    %c0_i32 = arith.constant 0 : i32
    %c0_i32_0 = arith.constant 0 : i32
    %c0_i32_1 = arith.constant 0 : i32
    return %arg0, %arg1, %c0_i32, %c0_i32_0 : i32, i32, i32, i32
  }
  func.func @transform_1(%arg0: i32, %arg1: i32) -> (i32, i32, i32, i32) {
    %c0_i32 = arith.constant 0 : i32
    %c0_i32_0 = arith.constant 0 : i32
    %c0_i32_1 = arith.constant 0 : i32
    return %arg0, %arg1, %c0_i32, %c0_i32_0 : i32, i32, i32, i32
  }
  func.func @transform_2(%arg0: i32, %arg1: i32) -> (i32, i32, i32, i32) {
    %c0_i32 = arith.constant 0 : i32
    %c0_i32_0 = arith.constant 0 : i32
    %c0_i32_1 = arith.constant 0 : i32
    return %arg0, %arg1, %c0_i32, %c0_i32_0 : i32, i32, i32, i32
  }
  func.func @transform_3(%arg0: i32, %arg1: i32) -> (i32, i32, i32) {
    %c0_i32 = arith.constant 0 : i32
    %c0_i32_0 = arith.constant 0 : i32
    %c0_i32_1 = arith.constant 0 : i32
    %c0_i32_2 = arith.constant 0 : i32
    return %c0_i32, %c0_i32_0, %c0_i32_1 : i32, i32, i32
  }
  func.func @transform_4(%arg0: i32, %arg1: i32) -> (i32, i32) {
    %c0_i32 = arith.constant 0 : i32
    %c0_i32_0 = arith.constant 0 : i32
    %c0_i32_1 = arith.constant 0 : i32
    return %c0_i32, %c0_i32_0 : i32, i32
  }
  func.func @transform_5(%arg0: i32, %arg1: i32) -> (i32, i32) {
    %c0_i32 = arith.constant 0 : i32
    %c0_i32_0 = arith.constant 0 : i32
    %c0_i32_1 = arith.constant 0 : i32
    return %c0_i32, %c0_i32_0 : i32, i32
  }
  func.func @transform_6(%arg0: i32, %arg1: i32) -> (i32, i32, i32, i32) {
    %c0_i32 = arith.constant 0 : i32
    %c0_i32_0 = arith.constant 0 : i32
    %c0_i32_1 = arith.constant 0 : i32
    return %arg0, %arg1, %c0_i32, %c0_i32_0 : i32, i32, i32, i32
  }
}

</mosaic_0001>

<bundles_post_ra>
// kernel: separable_conv2d.1
= control target key start
LH: loop header
LB: loop body
LE: loop exit
PB: predicated region body
PF: predicated region fallthrough
CT: control target
= control target key end

     0   :  { %s2812_s21 = smov 0   ;;  %s2814_s22 = smov 0   ;;  %s4181_s0 = inlined_call_operand.vmem [shape: f32[2,16,16,4], index: 0, kind: input, shape index: {}]   ;;  %s4182_s1 = inlined_call_operand.vmem [shape: f32[2,1,16,4], index: 1, kind: input, shape index: {}, may-alias: {1,2}]   ;;  %s4183_s2 = inlined_call_operand.vmem [shape: f32[2,1,16,4], index: 2, kind: input, shape index: {}, may-alias: {1,2}]   ;;  %s4184_s3 = inlined_call_operand.vmem [shape: f32[3,3,4], index: 3, kind: input, shape index: {}]   ;;  %s4185_s4 = inlined_call_operand.vmem [shape: bf16[4,8], index: 4, kind: input, shape index: {}]   ;;  %s4186_s5 = inlined_call_operand.vmem [shape: f32[1,8], index: 5, kind: input, shape index: {}]   ;;  %s4187_s6 = inlined_call_operand.vmem [shape: f32[2,16,16,8], index: 6, kind: output, shape index: {}]  }
   0x1   :  { %s2816_s23 = smov 0  }
   0x2 LB: > { %s28_s24 = sadd.s32 1, %s2770_s22  ;;  %p2634_p0 = scmp.ge.s32.totalorder %s2774_s23, 1  ;;  %s2774_s23 = sphi %s2816_s23, %s16_s23   ;;  %s2770_s22 = sphi %s2814_s22, %s4189_s22   ;;  %s2766_s21 = sphi %s2812_s21, %s4188_s21  }
   0x3   : > { %p30_p1 = scmp.ge.s32.totalorder %s28_s24, 2  ;;  %p266_p2 = scmp.lt.s32.totalorder %s2774_s23, 3 }
   0x5   : > { %s4191_s24 = smov (%p30_p1, %s28_s24), 0  ;;  %p267_p3 = pnand %p2634_p0, %p266_p2 }
   0x6   : > { %p325_p4 = scmp.lt.s32.totalorder (!%p267_p3), %s2766_s21, 1 }
   0x7   : > { %270 = sbr.rel (%p267_p3) target bundleno = 540 (0x21c), region = 44 }
   0xc   : > { %v2238_v0 = vld [vmem:[%s4185_s4] sm:$0x3]  ;;  %vm2294_vm0 = vcmask 1041408   ;;  %vm365_vm1 = vcmask 31744   ;;  %v552_v1 = vlaneseq  ;;  %v2776_v3 = vmov 0.0   ;;  %s4193_s21 = smov (!%p325_p4, %s2766_s21), 1 }
   0xd   : > { %2719 = vmatprep.subr.msk.bf16.mxu0 %vm2294_vm0, %v2238_v0  ;;  %2720 = vmatprep.subr.msk.bf16.mxu1 %vm2294_vm0, %v2238_v0  ;;  %v2296_v2 = vsel %vm2294_vm0, %v2238_v0, 0  ;;  %366 = vst.msk [vmem:[#allocation2] sm:$0xff] %vm365_vm1, %v2776_v3  ;;  %367 = vst.msk [vmem:[#allocation2 + $0x8] sm:$0xff] %vm365_vm1, %v2776_v3  ;;  %vm368_vm2 = vcmask 25600   ;;  %s2662_s27 = sshll.u32 %s4193_s21, 8  ;;  %s2663_s28 = sshll.u32 %s4193_s21, 4 }
   0xe   : > { %370 = vst.msk [vmem:[#allocation2 + $0x18] sm:$0xff] %vm365_vm1, %v2776_v3  ;;  %371 = vst.msk [vmem:[#allocation2 + $0x20] sm:$0xff] %vm365_vm1, %v2776_v3  ;;  %2684 = vmatpush3.bf16.msra.mxu0 %v2296_v2  ;;  %2718 = vmatpush3.bf16.msra.mxu1 %v2296_v2  ;;  %v553_v4 = vshrl.u32 %v552_v1, 7  ;;  %s2903_s7 = scalar_lea.vmem %s4181_s0, %s2662_s27  ;;  %s343_s10 = scalar_lea.vmem %s4182_s1, %s2663_s28  ;;  %v549_v8 = vld [vmem:[%s4184_s3] sm:$0x7]  ;;  %vm720_vm3 = vcmask 1046528  }
   0xf   : > { %373 = vst.msk [vmem:[#allocation2 + $0x30] sm:$0xff] %vm365_vm1, %v2776_v3  ;;  %374 = vst.msk [vmem:[#allocation2 + $0x38] sm:$0xff] %vm365_vm1, %v2776_v3  ;;  %v421_v5 = vld [vmem:[%s343_s10] sm:$0xff]  ;;  %v422_v6 = vld [vmem:[%s343_s10 + $0x8] sm:$0xff]  ;;  %vm965_vm4 = vcmask 1045504   ;;  %s352_s19 = scalar_lea.vmem %s4183_s2, %s2663_s28  ;;  %s4068_s29 = scalar_lea.vmem %s4187_s6, %s2662_s27  ;;  %vm2459_vm5 = vcmask 64512  }
  0x10   : > { %376 = vst.msk [vmem:[#allocation2 + $0x48] sm:$0xff] %vm365_vm1, %v2776_v3  ;;  %377 = vst.msk [vmem:[#allocation2 + $0x50] sm:$0xff] %vm365_vm1, %v2776_v3  ;;  %v430_v7 = vld [vmem:[%s2903_s7] sm:$0xff]  ;;  %v431_v9 = vld [vmem:[%s2903_s7 + $0x8] sm:$0xff]  ;;  %v554_v12 = vsub.s32 0, %v553_v4  ;;  %v622_v13 = vsub.s32 1, %v553_v4 }
  0x11   : > { %379 = vst.msk [vmem:[#allocation2 + $0x60] sm:$0xff] %vm365_vm1, %v2776_v3  ;;  %380 = vst.msk [vmem:[#allocation2 + $0x68] sm:$0xff] %vm365_vm1, %v2776_v3  ;;  %v432_v10 = vld [vmem:[%s2903_s7 + $0x10] sm:$0xff]  ;;  %v433_v11 = vld [vmem:[%s2903_s7 + $0x18] sm:$0xff]  ;;  %v867_v15 = vsub.s32 2, %v553_v4 }
  0x12   : > { %382 = vst.msk [vmem:[#allocation2 + $0x78] sm:$0xff] %vm365_vm1, %v2776_v3  ;;  %383 = vst.msk [vmem:[#allocation2 + $0x80] sm:$0xff] %vm365_vm1, %v2776_v3  ;;  %v550_v14 = vld [vmem:[%s4184_s3 + $0x4] sm:$0x7]  ;;  %v444_v16 = vld [vmem:[%s2903_s7 + $0x70] sm:$0xff]  ;;  %v2944_v26 = vrot.slane %v549_v8, %v554_v12  ;;  %v2946_v27 = vrot.slane %v549_v8, %v622_v13 }
  0x13   : > { %385 = vst.msk [vmem:[#allocation2 + $0x90] sm:$0xff] %vm365_vm1, %v2776_v3  ;;  %386 = vst.msk [vmem:[#allocation2 + $0x98] sm:$0xff] %vm365_vm1, %v2776_v3  ;;  %v445_v17 = vld [vmem:[%s2903_s7 + $0x78] sm:$0xff]  ;;  %v446_v18 = vld [vmem:[%s2903_s7 + $0x80] sm:$0xff]  ;;  %v2954_v31 = vrot.slane %v549_v8, %v867_v15  ;;  %v2962_v35 = vrot.slane %v550_v14, %v554_v12  ;;  %v2964_v36 = vrot.slane %v550_v14, %v622_v13 }
  0x14   : > { %388 = vst.msk [vmem:[#allocation2 + $0xa8] sm:$0xff] %vm365_vm1, %v2776_v3  ;;  %389 = vst.msk [vmem:[#allocation2 + $0xb0] sm:$0xff] %vm365_vm1, %v2776_v3  ;;  %v551_v19 = vld [vmem:[%s4184_s3 + $0x8] sm:$0x7]  ;;  %v448_v21 = vld [vmem:[%s2903_s7 + $0x90] sm:$0xff]  ;;  %v2972_v43 = vrot.slane %v550_v14, %v867_v15 }
  0x15   : > { %391 = vst.msk [vmem:[#allocation2 + $0xc0] sm:$0xff] %vm365_vm1, %v2776_v3  ;;  %392 = vst.msk [vmem:[#allocation2 + $0xc8] sm:$0xff] %vm365_vm1, %v2776_v3  ;;  %v447_v20 = vld [vmem:[%s2903_s7 + $0x88] sm:$0xff]  ;;  %v449_v22 = vld [vmem:[%s2903_s7 + $0x98] sm:$0xff]  ;;  %v2974_v44 = vrot.slane %v551_v19, %v554_v12  ;;  %v2976_v45 = vrot.slane %v551_v19, %v622_v13  ;;  %v2978_v46 = vrot.slane %v551_v19, %v867_v15 }
  0x16   : > { %394 = vst.msk [vmem:[#allocation2 + $0xd8] sm:$0xff] %vm365_vm1, %v2776_v3  ;;  %395 = vst.msk [vmem:[#allocation2 + $0xe0] sm:$0xff] %vm365_vm1, %v2776_v3  ;;  %v434_v23 = vld [vmem:[%s2903_s7 + $0x20] sm:$0xff]  ;;  %v435_v24 = vld [vmem:[%s2903_s7 + $0x28] sm:$0xff] }
  0x17   : > { %397 = vst.msk [vmem:[#allocation2 + $0xf0] sm:$0xff] %vm365_vm1, %v2776_v3  ;;  %398 = vst.msk [vmem:[#allocation2 + $0xf8] sm:$0xff] %vm365_vm1, %v2776_v3  ;;  %v450_v25 = vld [vmem:[%s2903_s7 + $0xa0] sm:$0xff]  ;;  %v451_v28 = vld [vmem:[%s2903_s7 + $0xa8] sm:$0xff] }
  0x18   : > { %400 = vst.msk [vmem:[#allocation2 + $0x108] sm:$0xff] %vm365_vm1, %v2776_v3  ;;  %401 = vst.msk [vmem:[#allocation2 + $0x110] sm:$0xff] %vm365_vm1, %v2776_v3  ;;  %v436_v29 = vld [vmem:[%s2903_s7 + $0x30] sm:$0xff]  ;;  %v437_v30 = vld [vmem:[%s2903_s7 + $0x38] sm:$0xff] }
  0x19   : > { %403 = vst.msk [vmem:[#allocation2 + $0x120] sm:$0xff] %vm365_vm1, %v2776_v3  ;;  %404 = vst.msk [vmem:[#allocation2 + $0x128] sm:$0xff] %vm365_vm1, %v2776_v3  ;;  %v452_v32 = vld [vmem:[%s2903_s7 + $0xb0] sm:$0xff]  ;;  %v453_v33 = vld [vmem:[%s2903_s7 + $0xb8] sm:$0xff] }
  0x1a   : > { %406 = vst.msk [vmem:[#allocation2 + $0x138] sm:$0xff] %vm365_vm1, %v2776_v3  ;;  %407 = vst.msk [vmem:[#allocation2 + $0x140] sm:$0xff] %vm365_vm1, %v2776_v3  ;;  %v438_v34 = vld [vmem:[%s2903_s7 + $0x40] sm:$0xff]  ;;  %v439_v37 = vld [vmem:[%s2903_s7 + $0x48] sm:$0xff] }
  0x1b   : > { %409 = vst.msk [vmem:[#allocation2 + $0x150] sm:$0xff] %vm365_vm1, %v2776_v3  ;;  %410 = vst.msk [vmem:[#allocation2 + $0x158] sm:$0xff] %vm365_vm1, %v2776_v3  ;;  %v454_v38 = vld [vmem:[%s2903_s7 + $0xc0] sm:$0xff]  ;;  %v455_v39 = vld [vmem:[%s2903_s7 + $0xc8] sm:$0xff] }
  0x1c   : > { %412 = vst.msk [vmem:[#allocation2 + $0x168] sm:$0xff] %vm365_vm1, %v2776_v3  ;;  %413 = vst.msk [vmem:[#allocation2 + $0x170] sm:$0xff] %vm365_vm1, %v2776_v3 }
  0x1d   : > { %415 = vst.msk [vmem:[#allocation2 + $0x180] sm:$0xff] %vm365_vm1, %v2776_v3  ;;  %416 = vst.msk [vmem:[#allocation2 + $0x188] sm:$0xff] %vm365_vm1, %v2776_v3 }
  0x1e   : > { %418 = vst.msk [vmem:[#allocation2 + $0x198] sm:$0xff] %vm365_vm1, %v2776_v3  ;;  %419 = vst.msk [vmem:[#allocation2 + $0x1a0] sm:$0xff] %vm365_vm1, %v2776_v3 }
  0x1f   : > { %369 = vst.msk [vmem:[#allocation2 + $0x10] sm:$0x3] %vm368_vm2, %v2776_v3  ;;  %372 = vst.msk [vmem:[#allocation2 + $0x28] sm:$0x3] %vm368_vm2, %v2776_v3 }
  0x20   : > { %375 = vst.msk [vmem:[#allocation2 + $0x40] sm:$0x3] %vm368_vm2, %v2776_v3  ;;  %378 = vst.msk [vmem:[#allocation2 + $0x58] sm:$0x3] %vm368_vm2, %v2776_v3 }
  0x21   : > { %381 = vst.msk [vmem:[#allocation2 + $0x70] sm:$0x3] %vm368_vm2, %v2776_v3  ;;  %384 = vst.msk [vmem:[#allocation2 + $0x88] sm:$0x3] %vm368_vm2, %v2776_v3 }
  0x22   : > { %387 = vst.msk [vmem:[#allocation2 + $0xa0] sm:$0x3] %vm368_vm2, %v2776_v3  ;;  %390 = vst.msk [vmem:[#allocation2 + $0xb8] sm:$0x3] %vm368_vm2, %v2776_v3 }
  0x23   : > { %393 = vst.msk [vmem:[#allocation2 + $0xd0] sm:$0x3] %vm368_vm2, %v2776_v3  ;;  %396 = vst.msk [vmem:[#allocation2 + $0xe8] sm:$0x3] %vm368_vm2, %v2776_v3 }
  0x24   : > { %399 = vst.msk [vmem:[#allocation2 + $0x100] sm:$0x3] %vm368_vm2, %v2776_v3  ;;  %402 = vst.msk [vmem:[#allocation2 + $0x118] sm:$0x3] %vm368_vm2, %v2776_v3 }
  0x25   : > { %405 = vst.msk [vmem:[#allocation2 + $0x130] sm:$0x3] %vm368_vm2, %v2776_v3  ;;  %408 = vst.msk [vmem:[#allocation2 + $0x148] sm:$0x3] %vm368_vm2, %v2776_v3 }
  0x26   : > { %411 = vst.msk [vmem:[#allocation2 + $0x160] sm:$0x3] %vm368_vm2, %v2776_v3  ;;  %414 = vst.msk [vmem:[#allocation2 + $0x178] sm:$0x3] %vm368_vm2, %v2776_v3 }
  0x27   : > { %417 = vst.msk [vmem:[#allocation2 + $0x190] sm:$0x3] %vm368_vm2, %v2776_v3  ;;  %420 = vst.msk [vmem:[#allocation2 + $0x1a8] sm:$0x3] %vm368_vm2, %v2776_v3 }
  0x28   : > { %423 = vst.msk [vmem:[#allocation2 + $0x1] sm:$0xff] %vm365_vm1, %v421_v5  ;;  %424 = vst.msk [vmem:[#allocation2 + $0x9] sm:$0xff] %vm365_vm1, %v422_v6 }
  0x29   : > { %463 = vst.msk [vmem:[#allocation2 + $0x19] sm:$0xff] %vm365_vm1, %v430_v7  ;;  %464 = vst.msk [vmem:[#allocation2 + $0x21] sm:$0xff] %vm365_vm1, %v431_v9 }
  0x2a   : > { %465 = vst.msk [vmem:[#allocation2 + $0x31] sm:$0xff] %vm365_vm1, %v432_v10  ;;  %466 = vst.msk [vmem:[#allocation2 + $0x39] sm:$0xff] %vm365_vm1, %v433_v11 }
  0x2b   : > { %477 = vst.msk [vmem:[#allocation2 + $0xc1] sm:$0xff] %vm365_vm1, %v444_v16  ;;  %478 = vst.msk [vmem:[#allocation2 + $0xc9] sm:$0xff] %vm365_vm1, %v445_v17 }
  0x2c   : > { %479 = vst.msk [vmem:[#allocation2 + $0xd9] sm:$0xff] %vm365_vm1, %v446_v18  ;;  %480 = vst.msk [vmem:[#allocation2 + $0xe1] sm:$0xff] %vm365_vm1, %v447_v20 }
  0x2d   : > { %481 = vst.msk [vmem:[#allocation2 + $0xf1] sm:$0xff] %vm365_vm1, %v448_v21  ;;  %482 = vst.msk [vmem:[#allocation2 + $0xf9] sm:$0xff] %vm365_vm1, %v449_v22 }
  0x2e   : > { %467 = vst.msk [vmem:[#allocation2 + $0x49] sm:$0xff] %vm365_vm1, %v434_v23  ;;  %468 = vst.msk [vmem:[#allocation2 + $0x51] sm:$0xff] %vm365_vm1, %v435_v24 }
  0x2f   : > { %483 = vst.msk [vmem:[#allocation2 + $0x109] sm:$0xff] %vm365_vm1, %v450_v25  ;;  %484 = vst.msk [vmem:[#allocation2 + $0x111] sm:$0xff] %vm365_vm1, %v451_v28  ;;  %v495_v40 = vld [vmem:[#allocation2] sm:$0xff]  ;;  %v496_v41 = vld [vmem:[#allocation2 + $0x8] sm:$0xff] }
  0x30   : > { %469 = vst.msk [vmem:[#allocation2 + $0x61] sm:$0xff] %vm365_vm1, %v436_v29  ;;  %470 = vst.msk [vmem:[#allocation2 + $0x69] sm:$0xff] %vm365_vm1, %v437_v30  ;;  %v497_v42 = vld [vmem:[#allocation2 + $0x10] sm:$0x3]  ;;  %v500_v47 = vld [vmem:[#allocation2 + $0x28] sm:$0x3]  ;;  %v556_v48 = vmul.f32 %v2944_v26, %v495_v40  ;;  %v557_v49 = vmul.f32 %v2944_v26, %v496_v41  ;;  %v624_v50 = vmul.f32 %v2946_v27, %v495_v40 }
  0x31   : > { %485 = vst.msk [vmem:[#allocation2 + $0x121] sm:$0xff] %vm365_vm1, %v452_v32  ;;  %486 = vst.msk [vmem:[#allocation2 + $0x129] sm:$0xff] %vm365_vm1, %v453_v33  ;;  %v625_v51 = vmul.f32 %v2946_v27, %v496_v41  ;;  %v2987_v52 = vld [vmem:[#allocation2 + $0x40] sm:$0x3]  ;;  %v626_v53 = vmul.f32 %v2946_v27, %v497_v42  ;;  %v2991_v54 = vmul.f32 %v2946_v27, %v500_v47  ;;  %v3004_v1 = vld [vmem:[#allocation2 + $0x18] sm:$0xff] }
  0x32   : > { %471 = vst.msk [vmem:[#allocation2 + $0x79] sm:$0xff] %vm365_vm1, %v438_v34  ;;  %472 = vst.msk [vmem:[#allocation2 + $0x81] sm:$0xff] %vm365_vm1, %v439_v37  ;;  %v869_v55 = vmul.f32 %v2954_v31, %v495_v40  ;;  %v870_v56 = vmul.f32 %v2954_v31, %v496_v41  ;;  %v2997_v57 = vmul.f32 %v2946_v27, %v2987_v52  ;;  %v721_v58 = vrot.slane %v624_v50, 1  ;;  %v3008_v6 = vld [vmem:[#allocation2 + $0x20] sm:$0xff]  ;;  %v3028_v29 = vld [vmem:[#allocation2 + $0x30] sm:$0xff] }
  0x33   : > { %487 = vst.msk [vmem:[#allocation2 + $0x139] sm:$0xff] %vm365_vm1, %v454_v38  ;;  %488 = vst.msk [vmem:[#allocation2 + $0x141] sm:$0xff] %vm365_vm1, %v455_v39  ;;  %v722_v59 = vrot.slane %v625_v51, 1  ;;  %v871_v60 = vmul.f32 %v2954_v31, %v497_v42  ;;  %v724_v61 = vrot.slane %v626_v53, 1  ;;  %v729_v62 = vrot.slane %v2991_v54, 1  ;;  %v3030_v30 = vld [vmem:[#allocation2 + $0x38] sm:$0xff] }
  0x34   : > { %v3002_v63 = vmul.f32 %v2954_v31, %v500_v47  ;;  %v966_v0 = vrot.slane %v869_v55, 2  ;;  %v734_v3 = vrot.slane %v2997_v57, 1  ;;  %v967_v4 = vrot.slane %v870_v56, 2  ;;  %v440_v50 = vld [vmem:[%s2903_s7 + $0x50] sm:$0xff]  ;;  %v441_v51 = vld [vmem:[%s2903_s7 + $0x58] sm:$0xff] }
  0x35   : > { %v723_v2 = vsel %vm720_vm3, %v721_v58, %v722_v59  ;;  %v969_v5 = vrot.slane %v871_v60, 2  ;;  %v725_v7 = vsel %vm720_vm3, %v722_v59, %v724_v61  ;;  %v1114_v10 = vmul.f32 %v2962_v35, %v3004_v1  ;;  %v456_v53 = vld [vmem:[%s2903_s7 + $0xd0] sm:$0xff]  ;;  %473 = vst.msk [vmem:[#allocation2 + $0x91] sm:$0xff] %vm365_vm1, %v440_v50  ;;  %474 = vst.msk [vmem:[#allocation2 + $0x99] sm:$0xff] %vm365_vm1, %v441_v51  ;;  %v457_v60 = vld [vmem:[%s2903_s7 + $0xd8] sm:$0xff] }
  0x36   : > { %v833_v8 = vadd.f32 %v723_v2, %v556_v48  ;;  %v974_v9 = vrot.slane %v3002_v63, 2  ;;  %v834_v11 = vadd.f32 %v725_v7, %v557_v49  ;;  %v968_v12 = vsel %vm965_vm4, %v966_v0, %v967_v4  ;;  %489 = vst.msk [vmem:[#allocation2 + $0x151] sm:$0xff] %vm365_vm1, %v456_v53  ;;  %490 = vst.msk [vmem:[#allocation2 + $0x159] sm:$0xff] %vm365_vm1, %v457_v60  ;;  %v3078_v51 = vld [vmem:[#allocation2 + $0xd8] sm:$0xff]  ;;  %v3080_v53 = vld [vmem:[#allocation2 + $0xe0] sm:$0xff] }
  0x37   : > { %v970_v13 = vsel %vm965_vm4, %v967_v4, %v969_v5  ;;  %v1115_v14 = vmul.f32 %v2962_v35, %v3008_v6  ;;  %v1182_v16 = vmul.f32 %v2964_v36, %v3004_v1  ;;  %v1183_v17 = vmul.f32 %v2964_v36, %v3008_v6 }
  0x38   : > { %v1078_v15 = vadd.f32 %v968_v12, %v833_v8  ;;  %v1184_v18 = vmul.f32 %v2964_v36, %v500_v47  ;;  %v1079_v19 = vadd.f32 %v970_v13, %v834_v11  ;;  %v1426_v20 = vmul.f32 %v2972_v43, %v3004_v1  ;;  %v519_v11 = vld [vmem:[#allocation2 + $0xc0] sm:$0xff]  ;;  %v520_v12 = vld [vmem:[#allocation2 + $0xc8] sm:$0xff] }
  0x39   : > { %v1427_v21 = vmul.f32 %v2972_v43, %v3008_v6  ;;  %v1428_v22 = vmul.f32 %v2972_v43, %v500_v47  ;;  %v1278_v24 = vrot.slane %v1182_v16, 1  ;;  %v1279_v25 = vrot.slane %v1183_v17, 1  ;;  %v521_v17 = vld [vmem:[#allocation2 + $0xd0] sm:$0x3] }
  0x3a   : > { %v1146_v23 = vadd.f32 %v1114_v10, %v1078_v15  ;;  %v1281_v28 = vrot.slane %v1184_v18, 1  ;;  %v1147_v32 = vadd.f32 %v1115_v14, %v1079_v19  ;;  %v1522_v33 = vrot.slane %v1426_v20, 2  ;;  %v3060_v18 = vld [vmem:[#allocation2 + $0x100] sm:$0x3] }
  0x3b   : > { %v1523_v34 = vrot.slane %v1427_v21, 2  ;;  %v1525_v37 = vrot.slane %v1428_v22, 2  ;;  %v1280_v38 = vsel %vm720_vm3, %v1278_v24, %v1279_v25  ;;  %v1670_v40 = vmul.f32 %v2974_v44, %v3028_v29 }
  0x3c   : > { %v1282_v39 = vsel %vm720_vm3, %v1279_v25, %v1281_v28  ;;  %v1671_v41 = vmul.f32 %v2974_v44, %v3030_v30  ;;  %v1390_v42 = vadd.f32 %v1280_v38, %v1146_v23  ;;  %v1738_v55 = vmul.f32 %v2976_v45, %v3028_v29 }
  0x3d   : > { %v1391_v47 = vadd.f32 %v1282_v39, %v1147_v32  ;;  %v1524_v48 = vsel %vm965_vm4, %v1522_v33, %v1523_v34  ;;  %v1526_v49 = vsel %vm965_vm4, %v1523_v34, %v1525_v37  ;;  %v1739_v56 = vmul.f32 %v2976_v45, %v3030_v30 }
  0x3e   : > { %v1740_v58 = vmul.f32 %v2976_v45, %v2987_v52  ;;  %v1982_v59 = vmul.f32 %v2978_v46, %v3028_v29  ;;  %v1634_v61 = vadd.f32 %v1524_v48, %v1390_v42  ;;  %v1983_v2 = vmul.f32 %v2978_v46, %v3030_v30 }
  0x3f   : > { %v1635_v0 = vadd.f32 %v1526_v49, %v1391_v47  ;;  %v1984_v4 = vmul.f32 %v2978_v46, %v2987_v52  ;;  %v1834_v5 = vrot.slane %v1738_v55, 1  ;;  %v1835_v7 = vrot.slane %v1739_v56, 1 }
  0x40   : > { %v1837_v8 = vrot.slane %v1740_v58, 1  ;;  %v2078_v10 = vrot.slane %v1982_v59, 2  ;;  %v1702_v13 = vadd.f32 %v1670_v40, %v1634_v61  ;;  %v2079_v15 = vrot.slane %v1983_v2, 2  ;;  %v3090_v2 = vld [vmem:[#allocation2 + $0xe8] sm:$0x3] }
  0x41   : > { %v1703_v14 = vadd.f32 %v1671_v41, %v1635_v0  ;;  %v2081_v16 = vrot.slane %v1984_v4, 2  ;;  %v1836_v19 = vsel %vm720_vm3, %v1834_v5, %v1835_v7  ;;  %v572_v21 = vmul.f32 %v2944_v26, %v519_v11 }
  0x42   : > { %v1838_v20 = vsel %vm720_vm3, %v1835_v7, %v1837_v8  ;;  %v573_v22 = vmul.f32 %v2944_v26, %v520_v12  ;;  %v1946_v23 = vadd.f32 %v1836_v19, %v1702_v13  ;;  %v2080_v25 = vsel %vm965_vm4, %v2078_v10, %v2079_v15 }
  0x43   : > { %v1947_v24 = vadd.f32 %v1838_v20, %v1703_v14  ;;  %v2082_v28 = vsel %vm965_vm4, %v2079_v15, %v2081_v16  ;;  %v648_v32 = vmul.f32 %v2946_v27, %v519_v11  ;;  %v649_v33 = vmul.f32 %v2946_v27, %v520_v12 }
  0x44   : > { %v650_v34 = vmul.f32 %v2946_v27, %v521_v17  ;;  %v3073_v37 = vmul.f32 %v2946_v27, %v3060_v18  ;;  %v2190_v38 = vadd.f32 %v2080_v25, %v1946_v23  ;;  %v893_v40 = vmul.f32 %v2954_v31, %v519_v11  ;;  %v3106_v23 = vld [vmem:[#allocation2 + $0xf0] sm:$0xff] }
  0x45   : > { %v2191_v39 = vadd.f32 %v2082_v28, %v1947_v24  ;;  %v894_v41 = vmul.f32 %v2954_v31, %v520_v12  ;;  %v761_v42 = vrot.slane %v648_v32, 1  ;;  %v762_v47 = vrot.slane %v649_v33, 1  ;;  %v3108_v33 = vld [vmem:[#allocation2 + $0xf8] sm:$0xff] }
  0x46   : > { %v764_v48 = vrot.slane %v650_v34, 1  ;;  %v774_v49 = vrot.slane %v3073_v37, 1  ;;  %v895_v55 = vmul.f32 %v2954_v31, %v521_v17  ;;  %v1006_v56 = vrot.slane %v893_v40, 2 }
  0x47   : > { %v2222_v50 = vpack.c.bf16 %v2191_v39, %v2190_v38  ;;  %v1007_v58 = vrot.slane %v894_v41, 2  ;;  %v763_v59 = vsel %vm720_vm3, %v761_v42, %v762_v47  ;;  %v1130_v61 = vmul.f32 %v2962_v35, %v3078_v51 }
  0x48   : > { %v765_v60 = vsel %vm720_vm3, %v762_v47, %v764_v48  ;;  %v1131_v0 = vmul.f32 %v2962_v35, %v3080_v53  ;;  %v849_v4 = vadd.f32 %v763_v59, %v572_v21  ;;  %v1009_v8 = vrot.slane %v895_v55, 2 }
  0x49   : > { %2685 = vmatprep.mubr.msk.bf16.mxu0 %vm365_vm1, %v2222_v50  ;;  %v850_v5 = vadd.f32 %v765_v60, %v573_v22  ;;  %v1008_v7 = vsel %vm965_vm4, %v1006_v56, %v1007_v58  ;;  %v1206_v10 = vmul.f32 %v2964_v36, %v3078_v51  ;;  %v1207_v11 = vmul.f32 %v2964_v36, %v3080_v53 }
  0x4a   : > { %v1208_v12 = vmul.f32 %v2964_v36, %v3090_v2  ;;  %v1450_v13 = vmul.f32 %v2972_v43, %v3078_v51  ;;  %v1010_v14 = vsel %vm965_vm4, %v1007_v58, %v1009_v8  ;;  %v1094_v15 = vadd.f32 %v1008_v7, %v849_v4  ;;  %v442_v4 = vld [vmem:[%s2903_s7 + $0x60] sm:$0xff] }
  0x4b   : > { %v1451_v16 = vmul.f32 %v2972_v43, %v3080_v53  ;;  %v1452_v17 = vmul.f32 %v2972_v43, %v3090_v2  ;;  %v1095_v19 = vadd.f32 %v1010_v14, %v850_v5  ;;  %v1318_v20 = vrot.slane %v1206_v10, 1  ;;  %v443_v5 = vld [vmem:[%s2903_s7 + $0x68] sm:$0xff]  ;;  %475 = vst.msk [vmem:[#allocation2 + $0xa9] sm:$0xff] %vm365_vm1, %v442_v4 }
  0x4c   : > { %v1319_v21 = vrot.slane %v1207_v11, 1  ;;  %v1321_v22 = vrot.slane %v1208_v12, 1  ;;  %v1162_v24 = vadd.f32 %v1130_v61, %v1094_v15  ;;  %v1562_v25 = vrot.slane %v1450_v13, 2  ;;  %476 = vst.msk [vmem:[#allocation2 + $0xb1] sm:$0xff] %vm365_vm1, %v443_v5 }
  0x4d   : > { %v1563_v28 = vrot.slane %v1451_v16, 2  ;;  %v1565_v32 = vrot.slane %v1452_v17, 2  ;;  %v1163_v34 = vadd.f32 %v1131_v0, %v1095_v19  ;;  %v1686_v40 = vmul.f32 %v2974_v44, %v3106_v23 }
  0x4e   : > { %v1320_v38 = vsel %vm720_vm3, %v1318_v20, %v1319_v21  ;;  %v1322_v39 = vsel %vm720_vm3, %v1319_v21, %v1321_v22  ;;  %v1687_v48 = vmul.f32 %v2974_v44, %v3108_v33  ;;  %v1762_v55 = vmul.f32 %v2976_v45, %v3106_v23 }
  0x4f   : > { %v1406_v41 = vadd.f32 %v1320_v38, %v1162_v24  ;;  %v1564_v42 = vsel %vm965_vm4, %v1562_v25, %v1563_v28  ;;  %v1566_v47 = vsel %vm965_vm4, %v1563_v28, %v1565_v32  ;;  %v1407_v50 = vadd.f32 %v1322_v39, %v1163_v34 }
  0x50   : > { %v1763_v56 = vmul.f32 %v2976_v45, %v3108_v33  ;;  %v1764_v58 = vmul.f32 %v2976_v45, %v3060_v18  ;;  %v2006_v60 = vmul.f32 %v2978_v46, %v3106_v23  ;;  %v2007_v61 = vmul.f32 %v2978_v46, %v3108_v33 }
  0x51   : > { %v1650_v59 = vadd.f32 %v1564_v42, %v1406_v41  ;;  %v2008_v0 = vmul.f32 %v2978_v46, %v3060_v18  ;;  %v1651_v7 = vadd.f32 %v1566_v47, %v1407_v50  ;;  %v1874_v8 = vrot.slane %v1762_v55, 1 }
  0x52   : > { %v1875_v10 = vrot.slane %v1763_v56, 1  ;;  %v1877_v11 = vrot.slane %v1764_v58, 1  ;;  %v2118_v13 = vrot.slane %v2006_v60, 2  ;;  %v2119_v14 = vrot.slane %v2007_v61, 2 }
  0x53   : > { %v1718_v12 = vadd.f32 %v1686_v40, %v1650_v59  ;;  %v2121_v15 = vrot.slane %v2008_v0, 2  ;;  %v1719_v16 = vadd.f32 %v1687_v48, %v1651_v7  ;;  %v558_v20 = vmul.f32 %v2944_v26, %v3004_v1 }
  0x54   : > { %v1876_v17 = vsel %vm720_vm3, %v1874_v8, %v1875_v10  ;;  %v1878_v19 = vsel %vm720_vm3, %v1875_v10, %v1877_v11  ;;  %v2120_v22 = vsel %vm965_vm4, %v2118_v13, %v2119_v14  ;;  %v559_v25 = vmul.f32 %v2944_v26, %v3008_v6 }
  0x55   : > { %v1962_v21 = vadd.f32 %v1876_v17, %v1718_v12  ;;  %v2122_v24 = vsel %vm965_vm4, %v2119_v14, %v2121_v15  ;;  %v1963_v28 = vadd.f32 %v1878_v19, %v1719_v16  ;;  %v627_v32 = vmul.f32 %v2946_v27, %v3004_v1  ;;  %v3177_v17 = vld [vmem:[#allocation2 + $0x50] sm:$0xff] }
  0x56   : > { %v628_v34 = vmul.f32 %v2946_v27, %v3008_v6  ;;  %v872_v38 = vmul.f32 %v2954_v31, %v3004_v1  ;;  %v873_v40 = vmul.f32 %v2954_v31, %v3008_v6  ;;  %v1116_v41 = vmul.f32 %v2962_v35, %v3028_v29 }
  0x57   : > { %v2206_v39 = vadd.f32 %v2120_v22, %v1962_v21  ;;  %v1117_v42 = vmul.f32 %v2962_v35, %v3030_v30  ;;  %v2207_v47 = vadd.f32 %v2122_v24, %v1963_v28  ;;  %v726_v48 = vrot.slane %v627_v32, 1  ;;  %v3183_v21 = vld [vmem:[#allocation2 + $0x58] sm:$0x3] }
  0x58   : > { %v727_v50 = vrot.slane %v628_v34, 1  ;;  %v971_v55 = vrot.slane %v872_v38, 2  ;;  %v972_v56 = vrot.slane %v873_v40, 2  ;;  %v1185_v58 = vmul.f32 %v2964_v36, %v3028_v29 }
  0x59   : > { %v1186_v1 = vmul.f32 %v2964_v36, %v3030_v30  ;;  %v1187_v6 = vmul.f32 %v2964_v36, %v2987_v52  ;;  %v2230_v59 = vpack.c.bf16 %v2207_v47, %v2206_v39  ;;  %v1429_v0 = vmul.f32 %v2972_v43, %v3028_v29 }
  0x5a   : > { %v728_v60 = vsel %vm720_vm3, %v726_v48, %v727_v50  ;;  %v730_v61 = vsel %vm720_vm3, %v727_v50, %v729_v62  ;;  %v973_v7 = vsel %vm965_vm4, %v971_v55, %v972_v56  ;;  %v975_v8 = vsel %vm965_vm4, %v972_v56, %v974_v9  ;;  %v3173_v62 = vld [vmem:[#allocation2 + $0x48] sm:$0xff]  ;;  %v458_v48 = vld [vmem:[%s2903_s7 + $0xe0] sm:$0xff] }
  0x5b   : > { %v835_v4 = vadd.f32 %v728_v60, %v558_v20  ;;  %v836_v5 = vadd.f32 %v730_v61, %v559_v25  ;;  %2701 = vmatprep.mubr.msk.bf16.mxu1 %vm365_vm1, %v2230_v59  ;;  %v1283_v10 = vrot.slane %v1185_v58, 1  ;;  %v1284_v11 = vrot.slane %v1186_v1, 1  ;;  %v459_v50 = vld [vmem:[%s2903_s7 + $0xe8] sm:$0xff]  ;;  %491 = vst.msk [vmem:[#allocation2 + $0x169] sm:$0xff] %vm365_vm1, %v458_v48 }
  0x5c   : > { %v1286_v12 = vrot.slane %v1187_v6, 1  ;;  %v1430_v54 = vmul.f32 %v2972_v43, %v3030_v30  ;;  %v1431_v15 = vmul.f32 %v2972_v43, %v2987_v52  ;;  %v1527_v16 = vrot.slane %v1429_v0, 2  ;;  %492 = vst.msk [vmem:[#allocation2 + $0x171] sm:$0xff] %vm365_vm1, %v459_v50 }
  0x5d   : > { %v1080_v13 = vadd.f32 %v973_v7, %v835_v4  ;;  %v1081_v14 = vadd.f32 %v975_v8, %v836_v5  ;;  %v1285_v63 = vsel %vm720_vm3, %v1283_v10, %v1284_v11  ;;  %v1672_v20 = vmul.f32 %v2974_v44, %v3173_v62 }
  0x5e   : > { %v1287_v9 = vsel %vm720_vm3, %v1284_v11, %v1286_v12  ;;  %v1528_v19 = vrot.slane %v1430_v54, 2  ;;  %v1530_v25 = vrot.slane %v1431_v15, 2  ;;  %v1673_v28 = vmul.f32 %v2974_v44, %v3177_v17 }
  0x5f   : > { %v1148_v22 = vadd.f32 %v1116_v41, %v1080_v13  ;;  %v1149_v24 = vadd.f32 %v1117_v42, %v1081_v14  ;;  %v1741_v34 = vmul.f32 %v2976_v45, %v3173_v62  ;;  %v1742_v38 = vmul.f32 %v2976_v45, %v3177_v17 }
  0x60   : > { %v1529_v32 = vsel %vm965_vm4, %v1527_v16, %v1528_v19  ;;  %v1743_v39 = vmul.f32 %v2976_v45, %v3183_v21  ;;  %v1531_v41 = vsel %vm965_vm4, %v1528_v19, %v1530_v25  ;;  %v1985_v42 = vmul.f32 %v2978_v46, %v3173_v62 }
  0x61   : > { %v1392_v40 = vadd.f32 %v1285_v63, %v1148_v22  ;;  %v1393_v47 = vadd.f32 %v1287_v9, %v1149_v24  ;;  %v1839_v55 = vrot.slane %v1741_v34, 1  ;;  %v1840_v56 = vrot.slane %v1742_v38, 1 }
  0x62   : > { %v1842_v58 = vrot.slane %v1743_v39, 1  ;;  %v1986_v1 = vmul.f32 %v2978_v46, %v3177_v17  ;;  %v1987_v60 = vmul.f32 %v2978_v46, %v3183_v21  ;;  %v2083_v61 = vrot.slane %v1985_v42, 2 }
  0x63   : > { %v1636_v6 = vadd.f32 %v1529_v32, %v1392_v40  ;;  %v1637_v59 = vadd.f32 %v1531_v41, %v1393_v47  ;;  %v1841_v0 = vsel %vm720_vm3, %v1839_v55, %v1840_v56  ;;  %v574_v7 = vmul.f32 %v2944_v26, %v3078_v51 }
  0x64   : > { %v1843_v4 = vsel %vm720_vm3, %v1840_v56, %v1842_v58  ;;  %v2084_v5 = vrot.slane %v1986_v1, 2  ;;  %v2086_v11 = vrot.slane %v1987_v60, 2  ;;  %v575_v12 = vmul.f32 %v2944_v26, %v3080_v53 }
  0x65   : > { %v1704_v8 = vadd.f32 %v1672_v20, %v1636_v6  ;;  %v1705_v10 = vadd.f32 %v1673_v28, %v1637_v59  ;;  %v651_v13 = vmul.f32 %v2946_v27, %v3078_v51  ;;  %v652_v14 = vmul.f32 %v2946_v27, %v3080_v53 }
  0x66   : > { %v2085_v54 = vsel %vm965_vm4, %v2083_v61, %v2084_v5  ;;  %v653_v15 = vmul.f32 %v2946_v27, %v3090_v2  ;;  %v2087_v9 = vsel %vm965_vm4, %v2084_v5, %v2086_v11  ;;  %v896_v19 = vmul.f32 %v2954_v31, %v3078_v51  ;;  %v3244_v5 = vld [vmem:[#allocation2 + $0x108] sm:$0xff] }
  0x67   : > { %v1948_v16 = vadd.f32 %v1841_v0, %v1704_v8  ;;  %v1949_v63 = vadd.f32 %v1843_v4, %v1705_v10  ;;  %v766_v20 = vrot.slane %v651_v13, 1  ;;  %v767_v22 = vrot.slane %v652_v14, 1 }
  0x68   : > { %v769_v24 = vrot.slane %v653_v15, 1  ;;  %v897_v25 = vmul.f32 %v2954_v31, %v3080_v53  ;;  %v898_v34 = vmul.f32 %v2954_v31, %v3090_v2  ;;  %v1011_v38 = vrot.slane %v896_v19, 2 }
  0x69   : > { %v2192_v28 = vadd.f32 %v2085_v54, %v1948_v16  ;;  %v2193_v32 = vadd.f32 %v2087_v9, %v1949_v63  ;;  %v768_v39 = vsel %vm720_vm3, %v766_v20, %v767_v22  ;;  %v1132_v51 = vmul.f32 %v2962_v35, %v3106_v23  ;;  %v3256_v20 = vld [vmem:[#allocation2 + $0x118] sm:$0x3] }
  0x6a   : > { %v770_v40 = vsel %vm720_vm3, %v767_v22, %v769_v24  ;;  %v1012_v47 = vrot.slane %v897_v25, 2  ;;  %v851_v42 = vadd.f32 %v768_v39, %v574_v7  ;;  %v1014_v50 = vrot.slane %v898_v34, 2 }
  0x6b   : > { %v2223_v41 = vpack.c.bf16 %v2193_v32, %v2192_v28  ;;  %v852_v48 = vadd.f32 %v770_v40, %v575_v12  ;;  %v1133_v55 = vmul.f32 %v2962_v35, %v3108_v33  ;;  %v1209_v2 = vmul.f32 %v2964_v36, %v3106_v23  ;;  %v3248_v12 = vld [vmem:[#allocation2 + $0x110] sm:$0xff] }
  0x6c   : > { %v1013_v53 = vsel %vm965_vm4, %v1011_v38, %v1012_v47  ;;  %v1210_v56 = vmul.f32 %v2964_v36, %v3108_v33  ;;  %v1015_v58 = vsel %vm965_vm4, %v1012_v47, %v1014_v50  ;;  %v1211_v6 = vmul.f32 %v2964_v36, %v3060_v18 }
  0x6d   : > { %2686 = vmatmul.mubr.msk.bf16.vlgmr.msra.gmra.mxu0 %vm365_vm1, %v2223_v41  ;;  %v1096_v1 = vadd.f32 %v1013_v53, %v851_v42  ;;  %v1453_v59 = vmul.f32 %v2972_v43, %v3106_v23  ;;  %v1097_v60 = vadd.f32 %v1015_v58, %v852_v48  ;;  %v1323_v61 = vrot.slane %v1209_v2, 1 }
  0x6e   : > { %v1324_v0 = vrot.slane %v1210_v56, 1  ;;  %v1454_v4 = vmul.f32 %v2972_v43, %v3108_v33  ;;  %v1326_v8 = vrot.slane %v1211_v6, 1  ;;  %v1455_v10 = vmul.f32 %v2972_v43, %v3060_v18 }
  0x6f   : > { %v1164_v7 = vadd.f32 %v1132_v51, %v1096_v1  ;;  %v1567_v11 = vrot.slane %v1453_v59, 2  ;;  %v1165_v54 = vadd.f32 %v1133_v55, %v1097_v60  ;;  %v1688_v15 = vmul.f32 %v2974_v44, %v3244_v5 }
  0x70   : > { %v1325_v13 = vsel %vm720_vm3, %v1323_v61, %v1324_v0  ;;  %v1568_v14 = vrot.slane %v1454_v4, 2  ;;  %v1327_v16 = vsel %vm720_vm3, %v1324_v0, %v1326_v8  ;;  %v1570_v9 = vrot.slane %v1455_v10, 2 }
  0x71   : > { %v1408_v63 = vadd.f32 %v1325_v13, %v1164_v7  ;;  %v1689_v19 = vmul.f32 %v2974_v44, %v3248_v12  ;;  %v1409_v22 = vadd.f32 %v1327_v16, %v1165_v54  ;;  %v1765_v25 = vmul.f32 %v2976_v45, %v3244_v5 }
  0x72   : > { %v1569_v24 = vsel %vm965_vm4, %v1567_v11, %v1568_v14  ;;  %v1766_v28 = vmul.f32 %v2976_v45, %v3248_v12  ;;  %v1571_v32 = vsel %vm965_vm4, %v1568_v14, %v1570_v9  ;;  %v1767_v38 = vmul.f32 %v2976_v45, %v3256_v20 }
  0x73   : > { %v1652_v34 = vadd.f32 %v1569_v24, %v1408_v63  ;;  %v2009_v39 = vmul.f32 %v2978_v46, %v3244_v5  ;;  %v1653_v40 = vadd.f32 %v1571_v32, %v1409_v22  ;;  %v1879_v47 = vrot.slane %v1765_v25, 1 }
  0x74   : > { %v1880_v51 = vrot.slane %v1766_v28, 1  ;;  %v2010_v41 = vmul.f32 %v2978_v46, %v3248_v12  ;;  %v1882_v48 = vrot.slane %v1767_v38, 1  ;;  %v2011_v50 = vmul.f32 %v2978_v46, %v3256_v20 }
  0x75   : > { %v1720_v42 = vadd.f32 %v1688_v15, %v1652_v34  ;;  %v2123_v53 = vrot.slane %v2009_v39, 2  ;;  %v1721_v55 = vadd.f32 %v1689_v19, %v1653_v40  ;;  %v560_v58 = vmul.f32 %v2944_v26, %v3028_v29 }
  0x76   : > { %v1881_v2 = vsel %vm720_vm3, %v1879_v47, %v1880_v51  ;;  %v2124_v56 = vrot.slane %v2010_v41, 2  ;;  %v1883_v1 = vsel %vm720_vm3, %v1880_v51, %v1882_v48  ;;  %v2126_v59 = vrot.slane %v2011_v50, 2 }
  0x77   : > { %v1964_v6 = vadd.f32 %v1881_v2, %v1720_v42  ;;  %v561_v60 = vmul.f32 %v2944_v26, %v3030_v30  ;;  %v1965_v61 = vadd.f32 %v1883_v1, %v1721_v55  ;;  %v630_v4 = vmul.f32 %v2946_v27, %v3028_v29  ;;  %v3311_v42 = vld [vmem:[#allocation2 + $0x60] sm:$0xff]  ;;  %v3315_v2 = vld [vmem:[#allocation2 + $0x68] sm:$0xff] }
  0x78   : > { %v2125_v0 = vsel %vm965_vm4, %v2123_v53, %v2124_v56  ;;  %v631_v7 = vmul.f32 %v2946_v27, %v3030_v30  ;;  %v2127_v8 = vsel %vm965_vm4, %v2124_v56, %v2126_v59  ;;  %v875_v11 = vmul.f32 %v2954_v31, %v3028_v29 }
  0x79   : > { %v2208_v10 = vadd.f32 %v2125_v0, %v1964_v6  ;;  %v876_v54 = vmul.f32 %v2954_v31, %v3030_v30  ;;  %v2209_v13 = vadd.f32 %v2127_v8, %v1965_v61  ;;  %v731_v14 = vrot.slane %v630_v4, 1  ;;  %v3323_v4 = vld [vmem:[#allocation2 + $0x70] sm:$0x3] }
  0x7a   : > { %v732_v15 = vrot.slane %v631_v7, 1  ;;  %v877_v16 = vmul.f32 %v2954_v31, %v2987_v52  ;;  %v976_v63 = vrot.slane %v875_v11, 2  ;;  %v1118_v19 = vmul.f32 %v2962_v35, %v3173_v62 }
  0x7b   : > { %v977_v9 = vrot.slane %v876_v54, 2  ;;  %v1119_v22 = vmul.f32 %v2962_v35, %v3177_v17  ;;  %v2231_v24 = vpack.c.bf16 %v2209_v13, %v2208_v10  ;;  %v1188_v34 = vmul.f32 %v2964_v36, %v3173_v62 }
  0x7c   : > { %v733_v29 = vsel %vm720_vm3, %v731_v14, %v732_v15  ;;  %v735_v30 = vsel %vm720_vm3, %v732_v15, %v734_v3  ;;  %v979_v25 = vrot.slane %v877_v16, 2  ;;  %v1189_v39 = vmul.f32 %v2964_v36, %v3177_v17  ;;  %v460_v16 = vld [vmem:[%s2903_s7 + $0xf0] sm:$0xff] }
  0x7d   : > { %v837_v28 = vadd.f32 %v733_v29, %v560_v58  ;;  %v838_v32 = vadd.f32 %v735_v30, %v561_v60  ;;  %v978_v52 = vsel %vm965_vm4, %v976_v63, %v977_v9  ;;  %2702 = vmatmul.mubr.msk.bf16.vlgmr.msra.gmra.mxu1 %vm365_vm1, %v2231_v24  ;;  %v1190_v57 = vmul.f32 %v2964_v36, %v3183_v21  ;;  %v461_v63 = vld [vmem:[%s2903_s7 + $0xf8] sm:$0xff] }
  0x7e   : > { %v980_v38 = vsel %vm965_vm4, %v977_v9, %v979_v25  ;;  %v1432_v3 = vmul.f32 %v2972_v43, %v3173_v62  ;;  %v1288_v51 = vrot.slane %v1188_v34, 1  ;;  %v1433_v41 = vmul.f32 %v2972_v43, %v3177_v17  ;;  %493 = vst.msk [vmem:[#allocation2 + $0x181] sm:$0xff] %vm365_vm1, %v460_v16  ;;  %494 = vst.msk [vmem:[#allocation2 + $0x189] sm:$0xff] %vm365_vm1, %v461_v63 }
  0x7f   : > { %v1082_v40 = vadd.f32 %v978_v52, %v837_v28  ;;  %v1083_v47 = vadd.f32 %v980_v38, %v838_v32  ;;  %v1289_v48 = vrot.slane %v1189_v39, 1  ;;  %v1291_v50 = vrot.slane %v1190_v57, 1 }
  0x80   : > { %v1434_v53 = vmul.f32 %v2972_v43, %v3183_v21  ;;  %v1532_v55 = vrot.slane %v1432_v3, 2  ;;  %v1533_v1 = vrot.slane %v1433_v41, 2  ;;  %v1674_v6 = vmul.f32 %v2974_v44, %v3311_v42 }
  0x81   : > { %v1150_v56 = vadd.f32 %v1118_v19, %v1082_v40  ;;  %v1151_v58 = vadd.f32 %v1119_v22, %v1083_v47  ;;  %v1290_v59 = vsel %vm720_vm3, %v1288_v51, %v1289_v48  ;;  %v1292_v60 = vsel %vm720_vm3, %v1289_v48, %v1291_v50 }
  0x82   : > { %v1535_v61 = vrot.slane %v1434_v53, 2  ;;  %v1675_v0 = vmul.f32 %v2974_v44, %v3315_v2  ;;  %v1534_v10 = vsel %vm965_vm4, %v1532_v55, %v1533_v1  ;;  %v1744_v11 = vmul.f32 %v2976_v45, %v3311_v42 }
  0x83   : > { %v1394_v7 = vadd.f32 %v1290_v59, %v1150_v56  ;;  %v1395_v8 = vadd.f32 %v1292_v60, %v1151_v58  ;;  %v1745_v13 = vmul.f32 %v2976_v45, %v3315_v2  ;;  %v1746_v14 = vmul.f32 %v2976_v45, %v3323_v4 }
  0x84   : > { %v1536_v54 = vsel %vm965_vm4, %v1533_v1, %v1535_v61  ;;  %v1988_v15 = vmul.f32 %v2978_v46, %v3311_v42  ;;  %v1844_v22 = vrot.slane %v1744_v11, 1  ;;  %v1989_v24 = vmul.f32 %v2978_v46, %v3315_v2 }
  0x85   : > { %v1638_v9 = vadd.f32 %v1534_v10, %v1394_v7  ;;  %v1639_v19 = vadd.f32 %v1536_v54, %v1395_v8  ;;  %v1845_v29 = vrot.slane %v1745_v13, 1  ;;  %v1847_v30 = vrot.slane %v1746_v14, 1 }
  0x86   : > { %v1990_v25 = vmul.f32 %v2978_v46, %v3323_v4  ;;  %v2088_v28 = vrot.slane %v1988_v15, 2  ;;  %v2089_v34 = vrot.slane %v1989_v24, 2  ;;  %v576_v38 = vmul.f32 %v2944_v26, %v3106_v23 }
  0x87   : > { %v1706_v32 = vadd.f32 %v1674_v6, %v1638_v9  ;;  %v1707_v52 = vadd.f32 %v1675_v0, %v1639_v19  ;;  %v1846_v39 = vsel %vm720_vm3, %v1844_v22, %v1845_v29  ;;  %v1848_v57 = vsel %vm720_vm3, %v1845_v29, %v1847_v30  ;;  %v3382_v22 = vld [vmem:[#allocation2 + $0x120] sm:$0xff] }
  0x88   : > { %v2091_v3 = vrot.slane %v1990_v25, 2  ;;  %v577_v40 = vmul.f32 %v2944_v26, %v3108_v33  ;;  %v2090_v41 = vsel %vm965_vm4, %v2088_v28, %v2089_v34  ;;  %v654_v48 = vmul.f32 %v2946_v27, %v3106_v23 }
  0x89   : > { %v1950_v47 = vadd.f32 %v1846_v39, %v1706_v32  ;;  %v1951_v51 = vadd.f32 %v1848_v57, %v1707_v52  ;;  %v655_v53 = vmul.f32 %v2946_v27, %v3108_v33  ;;  %v899_v55 = vmul.f32 %v2954_v31, %v3106_v23 }
  0x8a   : > { %v2092_v50 = vsel %vm965_vm4, %v2089_v34, %v2091_v3  ;;  %v900_v56 = vmul.f32 %v2954_v31, %v3108_v33  ;;  %v771_v6 = vrot.slane %v654_v48, 1  ;;  %v901_v59 = vmul.f32 %v2954_v31, %v3060_v18 }
  0x8b   : > { %v2194_v58 = vadd.f32 %v2090_v41, %v1950_v47  ;;  %v2195_v1 = vadd.f32 %v2092_v50, %v1951_v51  ;;  %v772_v60 = vrot.slane %v655_v53, 1  ;;  %v1016_v61 = vrot.slane %v899_v55, 2  ;;  %v3392_v47 = vld [vmem:[#allocation2 + $0x130] sm:$0x3] }
  0x8c   : > { %v1017_v0 = vrot.slane %v900_v56, 2  ;;  %v1134_v7 = vmul.f32 %v2962_v35, %v3244_v5  ;;  %v1019_v10 = vrot.slane %v901_v59, 2  ;;  %v1135_v23 = vmul.f32 %v2962_v35, %v3248_v12 }
  0x8d   : > { %v2224_v8 = vpack.c.bf16 %v2195_v1, %v2194_v58  ;;  %v1212_v33 = vmul.f32 %v2964_v36, %v3244_v5  ;;  %v773_v11 = vsel %vm720_vm3, %v771_v6, %v772_v60  ;;  %v775_v18 = vsel %vm720_vm3, %v772_v60, %v774_v49 }
  0x8e   : > { %v1018_v54 = vsel %vm965_vm4, %v1016_v61, %v1017_v0  ;;  %v1213_v13 = vmul.f32 %v2964_v36, %v3248_v12  ;;  %v853_v14 = vadd.f32 %v773_v11, %v576_v38  ;;  %v854_v15 = vadd.f32 %v775_v18, %v577_v40  ;;  %v3389_v38 = vld [vmem:[#allocation2 + $0x128] sm:$0xff] }
  0x8f   : > { %2689 = vmatprep.mubr.msk.bf16.mxu0 %vm365_vm1, %v2224_v8  ;;  %v1020_v16 = vsel %vm965_vm4, %v1017_v0, %v1019_v10  ;;  %v1214_v63 = vmul.f32 %v2964_v36, %v3256_v20  ;;  %v1328_v9 = vrot.slane %v1212_v33, 1  ;;  %v1456_v37 = vmul.f32 %v2972_v43, %v3244_v5 }
  0x90   : > { %v1329_v19 = vrot.slane %v1213_v13, 1  ;;  %v1457_v49 = vmul.f32 %v2972_v43, %v3248_v12  ;;  %v1098_v24 = vadd.f32 %v1018_v54, %v853_v14  ;;  %v1099_v29 = vadd.f32 %v1020_v16, %v854_v15 }
  0x91   : > { %v1331_v30 = vrot.slane %v1214_v63, 1  ;;  %v1458_v25 = vmul.f32 %v2972_v43, %v3256_v20  ;;  %v1572_v32 = vrot.slane %v1456_v37, 2  ;;  %v1690_v34 = vmul.f32 %v2974_v44, %v3382_v22 }
  0x92   : > { %v1330_v28 = vsel %vm720_vm3, %v1328_v9, %v1329_v19  ;;  %v1573_v52 = vrot.slane %v1457_v49, 2  ;;  %v1166_v39 = vadd.f32 %v1134_v7, %v1098_v24  ;;  %v1167_v57 = vadd.f32 %v1135_v23, %v1099_v29 }
  0x93   : > { %v1332_v3 = vsel %vm720_vm3, %v1329_v19, %v1331_v30  ;;  %v1575_v40 = vrot.slane %v1458_v25, 2  ;;  %v1691_v41 = vmul.f32 %v2974_v44, %v3389_v38  ;;  %v1768_v48 = vmul.f32 %v2976_v45, %v3382_v22 }
  0x94   : > { %v1574_v51 = vsel %vm965_vm4, %v1572_v32, %v1573_v52  ;;  %v1769_v50 = vmul.f32 %v2976_v45, %v3389_v38  ;;  %v1410_v53 = vadd.f32 %v1330_v28, %v1166_v39  ;;  %v1411_v55 = vadd.f32 %v1332_v3, %v1167_v57 }
  0x95   : > { %v1576_v56 = vsel %vm965_vm4, %v1573_v52, %v1575_v40  ;;  %v1770_v58 = vmul.f32 %v2976_v45, %v3392_v47  ;;  %v1884_v1 = vrot.slane %v1768_v48, 1  ;;  %v2012_v59 = vmul.f32 %v2978_v46, %v3382_v22 }
  0x96   : > { %v1885_v6 = vrot.slane %v1769_v50, 1  ;;  %v2013_v60 = vmul.f32 %v2978_v46, %v3389_v38  ;;  %v1654_v61 = vadd.f32 %v1574_v51, %v1410_v53  ;;  %v1655_v0 = vadd.f32 %v1576_v56, %v1411_v55 }
  0x97   : > { %v1887_v7 = vrot.slane %v1770_v58, 1  ;;  %v2014_v8 = vmul.f32 %v2978_v46, %v3392_v47  ;;  %v2128_v23 = vrot.slane %v2012_v59, 2  ;;  %v562_v11 = vmul.f32 %v2944_v26, %v3173_v62 }
  0x98   : > { %v1886_v10 = vsel %vm720_vm3, %v1884_v1, %v1885_v6  ;;  %v2129_v33 = vrot.slane %v2013_v60, 2  ;;  %v1722_v18 = vadd.f32 %v1690_v34, %v1654_v61  ;;  %v1723_v54 = vadd.f32 %v1691_v41, %v1655_v0 }
  0x99   : > { %v1888_v13 = vsel %vm720_vm3, %v1885_v6, %v1887_v7  ;;  %v2131_v14 = vrot.slane %v2014_v8, 2  ;;  %v563_v16 = vmul.f32 %v2944_v26, %v3177_v17  ;;  %v633_v63 = vmul.f32 %v2946_v27, %v3173_v62  ;;  %v3449_v7 = vld [vmem:[#allocation2 + $0x78] sm:$0xff] }
  0x9a   : > { %v2130_v15 = vsel %vm965_vm4, %v2128_v23, %v2129_v33  ;;  %v634_v9 = vmul.f32 %v2946_v27, %v3177_v17  ;;  %v1966_v19 = vadd.f32 %v1886_v10, %v1722_v18  ;;  %v1967_v37 = vadd.f32 %v1888_v13, %v1723_v54 }
  0x9b   : > { %v2132_v49 = vsel %vm965_vm4, %v2129_v33, %v2131_v14  ;;  %v635_v24 = vmul.f32 %v2946_v27, %v3183_v21  ;;  %v736_v29 = vrot.slane %v633_v63, 1  ;;  %v878_v25 = vmul.f32 %v2954_v31, %v3173_v62 }
  0x9c   : > { %v737_v30 = vrot.slane %v634_v9, 1  ;;  %v879_v28 = vmul.f32 %v2954_v31, %v3177_v17  ;;  %v2210_v32 = vadd.f32 %v2130_v15, %v1966_v19  ;;  %v2211_v52 = vadd.f32 %v2132_v49, %v1967_v37  ;;  %v3461_v19 = vld [vmem:[#allocation2 + $0x88] sm:$0x3] }
  0x9d   : > { %v739_v34 = vrot.slane %v635_v24, 1  ;;  %v880_v39 = vmul.f32 %v2954_v31, %v3183_v21  ;;  %v981_v3 = vrot.slane %v878_v25, 2  ;;  %v1120_v51 = vmul.f32 %v2962_v35, %v3311_v42 }
  0x9e   : > { %v738_v57 = vsel %vm720_vm3, %v736_v29, %v737_v30  ;;  %v982_v40 = vrot.slane %v879_v28, 2  ;;  %v2232_v41 = vpack.c.bf16 %v2211_v52, %v2210_v32  ;;  %v1121_v55 = vmul.f32 %v2962_v35, %v3315_v2 }
  0x9f   : > { %v740_v48 = vsel %vm720_vm3, %v737_v30, %v739_v34  ;;  %v839_v62 = vadd.f32 %v738_v57, %v562_v11  ;;  %v984_v50 = vrot.slane %v880_v39, 2  ;;  %v1191_v21 = vmul.f32 %v2964_v36, %v3311_v42  ;;  %v3453_v11 = vld [vmem:[#allocation2 + $0x80] sm:$0xff] }
  0xa0   : > { %v840_v53 = vadd.f32 %v740_v48, %v563_v16  ;;  %v983_v17 = vsel %vm965_vm4, %v981_v3, %v982_v40  ;;  %2705 = vmatprep.mubr.msk.bf16.mxu1 %vm365_vm1, %v2232_v41  ;;  %v1192_v1 = vmul.f32 %v2964_v36, %v3315_v2  ;;  %v1193_v6 = vmul.f32 %v2964_v36, %v3323_v4 }
  0xa1   : > { %v985_v56 = vsel %vm965_vm4, %v982_v40, %v984_v50  ;;  %v1084_v58 = vadd.f32 %v983_v17, %v839_v62  ;;  %v1293_v60 = vrot.slane %v1191_v21, 1  ;;  %v1435_v61 = vmul.f32 %v2972_v43, %v3311_v42 }
  0xa2   : > { %v1085_v59 = vadd.f32 %v985_v56, %v840_v53  ;;  %v1436_v0 = vmul.f32 %v2972_v43, %v3315_v2  ;;  %v1294_v10 = vrot.slane %v1192_v1, 1  ;;  %v1296_v23 = vrot.slane %v1193_v6, 1 }
  0xa3   : > { %v1152_v8 = vadd.f32 %v1120_v51, %v1084_v58  ;;  %v1437_v33 = vmul.f32 %v2972_v43, %v3323_v4  ;;  %v1537_v54 = vrot.slane %v1435_v61, 2  ;;  %v1676_v14 = vmul.f32 %v2974_v44, %v3449_v7  ;;  %v426_v61 = vld [vmem:[%s352_s19 + $0x8] sm:$0xff] }
  0xa4   : > { %v1153_v18 = vadd.f32 %v1121_v55, %v1085_v59  ;;  %v1538_v13 = vrot.slane %v1436_v0, 2  ;;  %v1295_v15 = vsel %vm720_vm3, %v1293_v60, %v1294_v10  ;;  %v1297_v16 = vsel %vm720_vm3, %v1294_v10, %v1296_v23  ;;  %v425_v60 = vld [vmem:[%s352_s19] sm:$0xff]  ;;  %429 = vst.msk [vmem:[#allocation2 + $0x1a1] sm:$0xff] %vm365_vm1, %v426_v61 }
  0xa5   : > { %v1540_v63 = vrot.slane %v1437_v33, 2  ;;  %v1677_v9 = vmul.f32 %v2974_v44, %v3453_v11  ;;  %v1396_v37 = vadd.f32 %v1295_v15, %v1152_v8  ;;  %v1747_v29 = vmul.f32 %v2976_v45, %v3449_v7  ;;  %428 = vst.msk [vmem:[#allocation2 + $0x199] sm:$0xff] %vm365_vm1, %v425_v60 }
  0xa6   : > { %v1397_v49 = vadd.f32 %v1297_v16, %v1153_v18  ;;  %v1539_v24 = vsel %vm965_vm4, %v1537_v54, %v1538_v13  ;;  %v1748_v25 = vmul.f32 %v2976_v45, %v3453_v11  ;;  %v1749_v28 = vmul.f32 %v2976_v45, %v3461_v19 }
  0xa7   : > { %v1541_v30 = vsel %vm965_vm4, %v1538_v13, %v1540_v63  ;;  %v1991_v32 = vmul.f32 %v2978_v46, %v3449_v7  ;;  %v1640_v52 = vadd.f32 %v1539_v24, %v1396_v37  ;;  %v1849_v39 = vrot.slane %v1747_v29, 1 }
  0xa8   : > { %v1641_v34 = vadd.f32 %v1541_v30, %v1397_v49  ;;  %v1992_v57 = vmul.f32 %v2978_v46, %v3453_v11  ;;  %v1850_v3 = vrot.slane %v1748_v25, 1  ;;  %v1852_v40 = vrot.slane %v1749_v28, 1 }
  0xa9   : > { %v1993_v51 = vmul.f32 %v2978_v46, %v3461_v19  ;;  %v2093_v41 = vrot.slane %v1991_v32, 2  ;;  %v1708_v48 = vadd.f32 %v1676_v14, %v1640_v52  ;;  %v578_v53 = vmul.f32 %v2944_v26, %v3244_v5 }
  0xaa   : > { %v1709_v62 = vadd.f32 %v1677_v9, %v1641_v34  ;;  %v2094_v50 = vrot.slane %v1992_v57, 2  ;;  %v1851_v17 = vsel %vm720_vm3, %v1849_v39, %v1850_v3  ;;  %v1853_v55 = vsel %vm720_vm3, %v1850_v3, %v1852_v40  ;;  %v3521_v3 = vld [vmem:[#allocation2 + $0x138] sm:$0xff] }
  0xab   : > { %v2096_v21 = vrot.slane %v1993_v51, 2  ;;  %v579_v56 = vmul.f32 %v2944_v26, %v3248_v12  ;;  %v1952_v58 = vadd.f32 %v1851_v17, %v1708_v48  ;;  %v657_v59 = vmul.f32 %v2946_v27, %v3244_v5 }
  0xac   : > { %v1953_v1 = vadd.f32 %v1853_v55, %v1709_v62  ;;  %v2095_v6 = vsel %vm965_vm4, %v2093_v41, %v2094_v50  ;;  %v658_v8 = vmul.f32 %v2946_v27, %v3248_v12  ;;  %v659_v10 = vmul.f32 %v2946_v27, %v3256_v20  ;;  %v3529_v55 = vld [vmem:[#allocation2 + $0x140] sm:$0xff] }
  0xad   : > { %v2097_v0 = vsel %vm965_vm4, %v2094_v50, %v2096_v21  ;;  %v902_v23 = vmul.f32 %v2954_v31, %v3244_v5  ;;  %v2196_v33 = vadd.f32 %v2095_v6, %v1952_v58  ;;  %v776_v54 = vrot.slane %v657_v59, 1 }
  0xae   : > { %v2197_v18 = vadd.f32 %v2097_v0, %v1953_v1  ;;  %v903_v13 = vmul.f32 %v2954_v31, %v3248_v12  ;;  %v777_v14 = vrot.slane %v658_v8, 1  ;;  %v779_v15 = vrot.slane %v659_v10, 1  ;;  %v3537_v0 = vld [vmem:[#allocation2 + $0x148] sm:$0x3] }
  0xaf   : > { %v904_v16 = vmul.f32 %v2954_v31, %v3256_v20  ;;  %v1021_v63 = vrot.slane %v902_v23, 2  ;;  %v1136_v5 = vmul.f32 %v2962_v35, %v3382_v22  ;;  %v1137_v49 = vmul.f32 %v2962_v35, %v3389_v38 }
  0xb0   : > { %v2225_v9 = vpack.c.bf16 %v2197_v18, %v2196_v33  ;;  %v1022_v37 = vrot.slane %v903_v13, 2  ;;  %v778_v24 = vsel %vm720_vm3, %v776_v54, %v777_v14  ;;  %v780_v29 = vsel %vm720_vm3, %v777_v14, %v779_v15 }
  0xb1   : > { %v1024_v30 = vrot.slane %v904_v16, 2  ;;  %v1215_v12 = vmul.f32 %v2964_v36, %v3382_v22  ;;  %v855_v20 = vadd.f32 %v778_v24, %v578_v53  ;;  %v856_v25 = vadd.f32 %v780_v29, %v579_v56 }
  0xb2   : > { %2690 = vmatmul.mubr.msk.bf16.gmra.mxu0 %vm365_vm1, %v2225_v9  ;;  %v1023_v28 = vsel %vm965_vm4, %v1021_v63, %v1022_v37  ;;  %v1216_v32 = vmul.f32 %v2964_v36, %v3389_v38  ;;  %v1217_v34 = vmul.f32 %v2964_v36, %v3392_v47  ;;  %v1459_v57 = vmul.f32 %v2972_v43, %v3382_v22 }
  0xb3   : > { %v1025_v52 = vsel %vm965_vm4, %v1022_v37, %v1024_v30  ;;  %v1333_v39 = vrot.slane %v1215_v12, 1  ;;  %v1100_v40 = vadd.f32 %v1023_v28, %v855_v20  ;;  %v1460_v48 = vmul.f32 %v2972_v43, %v3389_v38 }
  0xb4   : > { %v1101_v51 = vadd.f32 %v1025_v52, %v856_v25  ;;  %v1334_v41 = vrot.slane %v1216_v32, 1  ;;  %v1336_v62 = vrot.slane %v1217_v34, 1  ;;  %v1461_v50 = vmul.f32 %v2972_v43, %v3392_v47 }
  0xb5   : > { %v1577_v53 = vrot.slane %v1459_v57, 2  ;;  %v1692_v17 = vmul.f32 %v2974_v44, %v3521_v3  ;;  %v1168_v21 = vadd.f32 %v1136_v5, %v1100_v40  ;;  %v1578_v1 = vrot.slane %v1460_v48, 2 }
  0xb6   : > { %v1169_v56 = vadd.f32 %v1137_v49, %v1101_v51  ;;  %v1335_v58 = vsel %vm720_vm3, %v1333_v39, %v1334_v41  ;;  %v1337_v6 = vsel %vm720_vm3, %v1334_v41, %v1336_v62  ;;  %v1580_v59 = vrot.slane %v1461_v50, 2 }
  0xb7   : > { %v1693_v60 = vmul.f32 %v2974_v44, %v3529_v55  ;;  %v1771_v61 = vmul.f32 %v2976_v45, %v3521_v3  ;;  %v1412_v8 = vadd.f32 %v1335_v58, %v1168_v21  ;;  %v1579_v23 = vsel %vm965_vm4, %v1577_v53, %v1578_v1 }
  0xb8   : > { %v1413_v10 = vadd.f32 %v1337_v6, %v1169_v56  ;;  %v1772_v33 = vmul.f32 %v2976_v45, %v3529_v55  ;;  %v1581_v18 = vsel %vm965_vm4, %v1578_v1, %v1580_v59  ;;  %v1773_v54 = vmul.f32 %v2976_v45, %v3537_v0 }
  0xb9   : > { %v1889_v13 = vrot.slane %v1771_v61, 1  ;;  %v2015_v14 = vmul.f32 %v2978_v46, %v3521_v3  ;;  %v1656_v15 = vadd.f32 %v1579_v23, %v1412_v8  ;;  %v2016_v9 = vmul.f32 %v2978_v46, %v3529_v55 }
  0xba   : > { %v1657_v16 = vadd.f32 %v1581_v18, %v1413_v10  ;;  %v1890_v63 = vrot.slane %v1772_v33, 1  ;;  %v1892_v37 = vrot.slane %v1773_v54, 1  ;;  %v2017_v5 = vmul.f32 %v2978_v46, %v3537_v0 }
  0xbb   : > { %v2133_v49 = vrot.slane %v2015_v14, 2  ;;  %v564_v24 = vmul.f32 %v2944_v26, %v3311_v42  ;;  %v1724_v29 = vadd.f32 %v1692_v17, %v1656_v15  ;;  %v2134_v20 = vrot.slane %v2016_v9, 2 }
  0xbc   : > { %v1725_v30 = vadd.f32 %v1693_v60, %v1657_v16  ;;  %v1891_v12 = vsel %vm720_vm3, %v1889_v13, %v1890_v63  ;;  %v1893_v25 = vsel %vm720_vm3, %v1890_v63, %v1892_v37  ;;  %v2136_v28 = vrot.slane %v2017_v5, 2  ;;  %v3588_v63 = vld [vmem:[#allocation2 + $0x90] sm:$0xff] }
  0xbd   : > { %v565_v32 = vmul.f32 %v2944_v26, %v3315_v2  ;;  %v636_v52 = vmul.f32 %v2946_v27, %v3311_v42  ;;  %v1968_v34 = vadd.f32 %v1891_v12, %v1724_v29  ;;  %v2135_v57 = vsel %vm965_vm4, %v2133_v49, %v2134_v20 }
  0xbe   : > { %v1969_v39 = vadd.f32 %v1893_v25, %v1725_v30  ;;  %v637_v40 = vmul.f32 %v2946_v27, %v3315_v2  ;;  %v2137_v51 = vsel %vm965_vm4, %v2134_v20, %v2136_v28  ;;  %v638_v41 = vmul.f32 %v2946_v27, %v3323_v4  ;;  %v3596_v20 = vld [vmem:[#allocation2 + $0x98] sm:$0xff] }
  0xbf   : > { %v741_v48 = vrot.slane %v636_v52, 1  ;;  %v881_v62 = vmul.f32 %v2954_v31, %v3311_v42  ;;  %v2212_v50 = vadd.f32 %v2135_v57, %v1968_v34  ;;  %v882_v21 = vmul.f32 %v2954_v31, %v3315_v2  ;;  %v3600_v34 = vld [vmem:[#allocation2 + $0xa0] sm:$0x3] }
  0xc0   : > { %v2213_v53 = vadd.f32 %v2137_v51, %v1969_v39  ;;  %v742_v17 = vrot.slane %v637_v40, 1  ;;  %v744_v56 = vrot.slane %v638_v41, 1  ;;  %v883_v58 = vmul.f32 %v2954_v31, %v3323_v4 }
  0xc1   : > { %v986_v1 = vrot.slane %v881_v62, 2  ;;  %v1122_v6 = vmul.f32 %v2962_v35, %v3449_v7  ;;  %v987_v61 = vrot.slane %v882_v21, 2  ;;  %v1123_v42 = vmul.f32 %v2962_v35, %v3453_v11 }
  0xc2   : > { %v2233_v59 = vpack.c.bf16 %v2213_v53, %v2212_v50  ;;  %v743_v60 = vsel %vm720_vm3, %v741_v48, %v742_v17  ;;  %v745_v8 = vsel %vm720_vm3, %v742_v17, %v744_v56  ;;  %v989_v23 = vrot.slane %v883_v58, 2 }
  0xc3   : > { %v841_v10 = vadd.f32 %v743_v60, %v564_v24  ;;  %v1194_v2 = vmul.f32 %v2964_v36, %v3449_v7  ;;  %v842_v4 = vadd.f32 %v745_v8, %v565_v32  ;;  %v988_v33 = vsel %vm965_vm4, %v986_v1, %v987_v61 }
  0xc4   : > { %2706 = vmatmul.mubr.msk.bf16.gmra.mxu1 %vm365_vm1, %v2233_v59  ;;  %v1195_v18 = vmul.f32 %v2964_v36, %v3453_v11  ;;  %v1196_v54 = vmul.f32 %v2964_v36, %v3461_v19  ;;  %v990_v13 = vsel %vm965_vm4, %v987_v61, %v989_v23  ;;  %v1438_v16 = vmul.f32 %v2972_v43, %v3449_v7 }
  0xc5   : > { %v1086_v14 = vadd.f32 %v988_v33, %v841_v10  ;;  %v1298_v15 = vrot.slane %v1194_v2, 1  ;;  %v1087_v9 = vadd.f32 %v990_v13, %v842_v4  ;;  %v1439_v49 = vmul.f32 %v2972_v43, %v3453_v11 }
  0xc6   : > { %v1299_v37 = vrot.slane %v1195_v18, 1  ;;  %v1301_v5 = vrot.slane %v1196_v54, 1  ;;  %v1440_v29 = vmul.f32 %v2972_v43, %v3461_v19  ;;  %v1542_v30 = vrot.slane %v1438_v16, 2 }
  0xc7   : > { %v1154_v24 = vadd.f32 %v1122_v6, %v1086_v14  ;;  %v1678_v12 = vmul.f32 %v2974_v44, %v3588_v63  ;;  %v1155_v25 = vadd.f32 %v1123_v42, %v1087_v9  ;;  %v1543_v52 = vrot.slane %v1439_v49, 2 }
  0xc8   : > { %v1300_v28 = vsel %vm720_vm3, %v1298_v15, %v1299_v37  ;;  %v1302_v32 = vsel %vm720_vm3, %v1299_v37, %v1301_v5  ;;  %v1545_v57 = vrot.slane %v1440_v29, 2  ;;  %v1679_v40 = vmul.f32 %v2974_v44, %v3596_v20 }
  0xc9   : > { %v1398_v39 = vadd.f32 %v1300_v28, %v1154_v24  ;;  %v1750_v51 = vmul.f32 %v2976_v45, %v3588_v63  ;;  %v1399_v41 = vadd.f32 %v1302_v32, %v1155_v25  ;;  %v1544_v48 = vsel %vm965_vm4, %v1542_v30, %v1543_v52 }
  0xca   : > { %v1751_v62 = vmul.f32 %v2976_v45, %v3596_v20  ;;  %v1752_v50 = vmul.f32 %v2976_v45, %v3600_v34  ;;  %v1546_v53 = vsel %vm965_vm4, %v1543_v52, %v1545_v57  ;;  %v1994_v56 = vmul.f32 %v2978_v46, %v3588_v63 }
  0xcb   : > { %v1642_v17 = vadd.f32 %v1544_v48, %v1398_v39  ;;  %v1854_v21 = vrot.slane %v1750_v51, 1  ;;  %v1643_v58 = vadd.f32 %v1546_v53, %v1399_v41  ;;  %v1995_v59 = vmul.f32 %v2978_v46, %v3596_v20 }
  0xcc   : > { %v1855_v1 = vrot.slane %v1751_v62, 1  ;;  %v1857_v6 = vrot.slane %v1752_v50, 1  ;;  %v1996_v61 = vmul.f32 %v2978_v46, %v3600_v34  ;;  %v2098_v42 = vrot.slane %v1994_v56, 2 }
  0xcd   : > { %v1710_v60 = vadd.f32 %v1678_v12, %v1642_v17  ;;  %v580_v8 = vmul.f32 %v2944_v26, %v3382_v22  ;;  %v1711_v10 = vadd.f32 %v1679_v40, %v1643_v58  ;;  %v2099_v4 = vrot.slane %v1995_v59, 2 }
  0xce   : > { %v1856_v23 = vsel %vm720_vm3, %v1854_v21, %v1855_v1  ;;  %v1858_v2 = vsel %vm720_vm3, %v1855_v1, %v1857_v6  ;;  %v2101_v18 = vrot.slane %v1996_v61, 2  ;;  %v581_v54 = vmul.f32 %v2944_v26, %v3389_v38  ;;  %v3657_v6 = vld [vmem:[#allocation2 + $0x150] sm:$0xff] }
  0xcf   : > { %v1954_v33 = vadd.f32 %v1856_v23, %v1710_v60  ;;  %v660_v13 = vmul.f32 %v2946_v27, %v3382_v22  ;;  %v1955_v14 = vadd.f32 %v1858_v2, %v1711_v10  ;;  %v2100_v15 = vsel %vm965_vm4, %v2098_v42, %v2099_v4 }
  0xd0   : > { %v661_v16 = vmul.f32 %v2946_v27, %v3389_v38  ;;  %v662_v9 = vmul.f32 %v2946_v27, %v3392_v47  ;;  %v2102_v37 = vsel %vm965_vm4, %v2099_v4, %v2101_v18  ;;  %v905_v24 = vmul.f32 %v2954_v31, %v3382_v22  ;;  %v3663_v4 = vld [vmem:[#allocation2 + $0x158] sm:$0xff] }
  0xd1   : > { %v2198_v5 = vadd.f32 %v2100_v15, %v1954_v33  ;;  %v781_v49 = vrot.slane %v660_v13, 1  ;;  %v2199_v29 = vadd.f32 %v2102_v37, %v1955_v14  ;;  %v906_v25 = vmul.f32 %v2954_v31, %v3389_v38  ;;  %v3667_v14 = vld [vmem:[#allocation2 + $0x160] sm:$0x3] }
  0xd2   : > { %v782_v30 = vrot.slane %v661_v16, 1  ;;  %v784_v12 = vrot.slane %v662_v9, 1  ;;  %v907_v28 = vmul.f32 %v2954_v31, %v3392_v47  ;;  %v1026_v32 = vrot.slane %v905_v24, 2 }
  0xd3   : > { %v1138_v52 = vmul.f32 %v2962_v35, %v3521_v3  ;;  %v1139_v39 = vmul.f32 %v2962_v35, %v3529_v55  ;;  %v2226_v57 = vpack.c.bf16 %v2199_v29, %v2198_v5  ;;  %v1027_v51 = vrot.slane %v906_v25, 2 }
  0xd4   : > { %v783_v40 = vsel %vm720_vm3, %v781_v49, %v782_v30  ;;  %v785_v22 = vsel %vm720_vm3, %v782_v30, %v784_v12  ;;  %v1029_v62 = vrot.slane %v907_v28, 2  ;;  %v1218_v38 = vmul.f32 %v2964_v36, %v3521_v3 }
  0xd5   : > { %v857_v41 = vadd.f32 %v783_v40, %v580_v8  ;;  %v858_v48 = vadd.f32 %v785_v22, %v581_v54  ;;  %2693 = vmatprep.mubr.msk.bf16.mxu0 %vm365_vm1, %v2226_v57  ;;  %v1028_v47 = vsel %vm965_vm4, %v1026_v32, %v1027_v51  ;;  %v1219_v50 = vmul.f32 %v2964_v36, %v3529_v55 }
  0xd6   : > { %v1220_v53 = vmul.f32 %v2964_v36, %v3537_v0  ;;  %v1462_v17 = vmul.f32 %v2972_v43, %v3521_v3  ;;  %v1030_v21 = vsel %vm965_vm4, %v1027_v51, %v1029_v62  ;;  %v1338_v58 = vrot.slane %v1218_v38, 1 }
  0xd7   : > { %v1102_v56 = vadd.f32 %v1028_v47, %v857_v41  ;;  %v1463_v1 = vmul.f32 %v2972_v43, %v3529_v55  ;;  %v1103_v59 = vadd.f32 %v1030_v21, %v858_v48  ;;  %v1339_v60 = vrot.slane %v1219_v50, 1 }
  0xd8   : > { %v1341_v61 = vrot.slane %v1220_v53, 1  ;;  %v1464_v42 = vmul.f32 %v2972_v43, %v3537_v0  ;;  %v1582_v10 = vrot.slane %v1462_v17, 2  ;;  %v1694_v2 = vmul.f32 %v2974_v44, %v3657_v6 }
  0xd9   : > { %v1170_v8 = vadd.f32 %v1138_v52, %v1102_v56  ;;  %v1583_v23 = vrot.slane %v1463_v1, 2  ;;  %v1171_v33 = vadd.f32 %v1139_v39, %v1103_v59  ;;  %v1340_v18 = vsel %vm720_vm3, %v1338_v58, %v1339_v60 }
  0xda   : > { %v1342_v54 = vsel %vm720_vm3, %v1339_v60, %v1341_v61  ;;  %v1585_v13 = vrot.slane %v1464_v42, 2  ;;  %v1695_v9 = vmul.f32 %v2974_v44, %v3663_v4  ;;  %v1774_v37 = vmul.f32 %v2976_v45, %v3657_v6 }
  0xdb   : > { %v1414_v15 = vadd.f32 %v1340_v18, %v1170_v8  ;;  %v1584_v16 = vsel %vm965_vm4, %v1582_v10, %v1583_v23  ;;  %v1415_v5 = vadd.f32 %v1342_v54, %v1171_v33  ;;  %v1775_v24 = vmul.f32 %v2976_v45, %v3663_v4 }
  0xdc   : > { %v1586_v49 = vsel %vm965_vm4, %v1583_v23, %v1585_v13  ;;  %v1776_v29 = vmul.f32 %v2976_v45, %v3667_v14  ;;  %v1894_v12 = vrot.slane %v1774_v37, 1  ;;  %v2018_v25 = vmul.f32 %v2978_v46, %v3657_v6 }
  0xdd   : > { %v1658_v30 = vadd.f32 %v1584_v16, %v1414_v15  ;;  %v2019_v28 = vmul.f32 %v2978_v46, %v3663_v4  ;;  %v1659_v32 = vadd.f32 %v1586_v49, %v1415_v5  ;;  %v1895_v52 = vrot.slane %v1775_v24, 1 }
  0xde   : > { %v1897_v39 = vrot.slane %v1776_v29, 1  ;;  %v2020_v57 = vmul.f32 %v2978_v46, %v3667_v14  ;;  %v2138_v22 = vrot.slane %v2018_v25, 2  ;;  %v566_v41 = vmul.f32 %v2944_v26, %v3449_v7 }
  0xdf   : > { %v1726_v40 = vadd.f32 %v1694_v2, %v1658_v30  ;;  %v2139_v51 = vrot.slane %v2019_v28, 2  ;;  %v1727_v48 = vadd.f32 %v1695_v9, %v1659_v32  ;;  %v1896_v62 = vsel %vm720_vm3, %v1894_v12, %v1895_v52 }
  0xe0   : > { %v1898_v38 = vsel %vm720_vm3, %v1895_v52, %v1897_v39  ;;  %v2141_v47 = vrot.slane %v2020_v57, 2  ;;  %v567_v17 = vmul.f32 %v2944_v26, %v3453_v11  ;;  %v639_v21 = vmul.f32 %v2946_v27, %v3449_v7  ;;  %v3724_v39 = vld [vmem:[#allocation2 + $0xa8] sm:$0xff] }
  0xe1   : > { %v1970_v50 = vadd.f32 %v1896_v62, %v1726_v40  ;;  %v2140_v53 = vsel %vm965_vm4, %v2138_v22, %v2139_v51  ;;  %v1971_v56 = vadd.f32 %v1898_v38, %v1727_v48  ;;  %v640_v1 = vmul.f32 %v2946_v27, %v3453_v11 }
  0xe2   : > { %v2142_v58 = vsel %vm965_vm4, %v2139_v51, %v2141_v47  ;;  %v641_v59 = vmul.f32 %v2946_v27, %v3461_v19  ;;  %v746_v61 = vrot.slane %v639_v21, 1  ;;  %v884_v42 = vmul.f32 %v2954_v31, %v3449_v7 }
  0xe3   : > { %v2214_v60 = vadd.f32 %v2140_v53, %v1970_v50  ;;  %v885_v8 = vmul.f32 %v2954_v31, %v3453_v11  ;;  %v2215_v10 = vadd.f32 %v2142_v58, %v1971_v56  ;;  %v747_v23 = vrot.slane %v640_v1, 1  ;;  %v3736_v56 = vld [vmem:[#allocation2 + $0xb8] sm:$0x3] }
  0xe4   : > { %v749_v2 = vrot.slane %v641_v59, 1  ;;  %v886_v33 = vmul.f32 %v2954_v31, %v3461_v19  ;;  %v991_v18 = vrot.slane %v884_v42, 2  ;;  %v1124_v13 = vmul.f32 %v2962_v35, %v3588_v63 }
  0xe5   : > { %v992_v54 = vrot.slane %v885_v8, 2  ;;  %v1125_v15 = vmul.f32 %v2962_v35, %v3596_v20  ;;  %v2234_v16 = vpack.c.bf16 %v2215_v10, %v2214_v60  ;;  %v748_v7 = vsel %vm720_vm3, %v746_v61, %v747_v23 }
  0xe6   : > { %v750_v9 = vsel %vm720_vm3, %v747_v23, %v749_v2  ;;  %v994_v11 = vrot.slane %v886_v33, 2  ;;  %v843_v37 = vadd.f32 %v748_v7, %v566_v41  ;;  %v1197_v19 = vmul.f32 %v2964_v36, %v3588_v63  ;;  %v3728_v41 = vld [vmem:[#allocation2 + $0xb0] sm:$0xff] }
  0xe7   : > { %v844_v5 = vadd.f32 %v750_v9, %v567_v17  ;;  %v993_v49 = vsel %vm965_vm4, %v991_v18, %v992_v54  ;;  %2709 = vmatprep.mubr.msk.bf16.mxu1 %vm365_vm1, %v2234_v16  ;;  %v1198_v29 = vmul.f32 %v2964_v36, %v3596_v20  ;;  %v1199_v30 = vmul.f32 %v2964_v36, %v3600_v34 }
  0xe8   : > { %v995_v24 = vsel %vm965_vm4, %v992_v54, %v994_v11  ;;  %v1441_v12 = vmul.f32 %v2972_v43, %v3588_v63  ;;  %v1088_v25 = vadd.f32 %v993_v49, %v843_v37  ;;  %v1303_v32 = vrot.slane %v1197_v19, 1 }
  0xe9   : > { %v1089_v28 = vadd.f32 %v995_v24, %v844_v5  ;;  %v1442_v52 = vmul.f32 %v2972_v43, %v3596_v20  ;;  %v1304_v57 = vrot.slane %v1198_v29, 1  ;;  %v1306_v40 = vrot.slane %v1199_v30, 1 }
  0xea   : > { %v1443_v22 = vmul.f32 %v2972_v43, %v3600_v34  ;;  %v1547_v51 = vrot.slane %v1441_v12, 2  ;;  %v1156_v48 = vadd.f32 %v1124_v13, %v1088_v25  ;;  %v1680_v47 = vmul.f32 %v2974_v44, %v3724_v39 }
  0xeb   : > { %v1157_v62 = vadd.f32 %v1125_v15, %v1089_v28  ;;  %v1548_v38 = vrot.slane %v1442_v52, 2  ;;  %v1305_v50 = vsel %vm720_vm3, %v1303_v32, %v1304_v57  ;;  %v1307_v53 = vsel %vm720_vm3, %v1304_v57, %v1306_v40 }
  0xec   : > { %v1550_v17 = vrot.slane %v1443_v22, 2  ;;  %v1681_v21 = vmul.f32 %v2974_v44, %v3728_v41  ;;  %v1400_v58 = vadd.f32 %v1305_v50, %v1156_v48  ;;  %v1753_v60 = vmul.f32 %v2976_v45, %v3724_v39 }
  0xed   : > { %v1401_v1 = vadd.f32 %v1307_v53, %v1157_v62  ;;  %v1549_v59 = vsel %vm965_vm4, %v1547_v51, %v1548_v38  ;;  %v1754_v42 = vmul.f32 %v2976_v45, %v3728_v41  ;;  %v1755_v8 = vmul.f32 %v2976_v45, %v3736_v56 }
  0xee   : > { %v1551_v61 = vsel %vm965_vm4, %v1548_v38, %v1550_v17  ;;  %v1997_v10 = vmul.f32 %v2978_v46, %v3724_v39  ;;  %v1644_v23 = vadd.f32 %v1549_v59, %v1400_v58  ;;  %v1859_v33 = vrot.slane %v1753_v60, 1 }
  0xef   : > { %v1645_v2 = vadd.f32 %v1551_v61, %v1401_v1  ;;  %v1998_v18 = vmul.f32 %v2978_v46, %v3728_v41  ;;  %v1860_v54 = vrot.slane %v1754_v42, 1  ;;  %v1862_v13 = vrot.slane %v1755_v8, 1 }
  0xf0   : > { %v1999_v15 = vmul.f32 %v2978_v46, %v3736_v56  ;;  %v2103_v16 = vrot.slane %v1997_v10, 2  ;;  %v1712_v7 = vadd.f32 %v1680_v47, %v1644_v23  ;;  %v582_v37 = vmul.f32 %v2944_v26, %v3521_v3 }
  0xf1   : > { %v1713_v9 = vadd.f32 %v1681_v21, %v1645_v2  ;;  %v2104_v11 = vrot.slane %v1998_v18, 2  ;;  %v1861_v5 = vsel %vm720_vm3, %v1859_v33, %v1860_v54  ;;  %v1863_v49 = vsel %vm720_vm3, %v1860_v54, %v1862_v13  ;;  %v3789_v33 = vld [vmem:[#allocation2 + $0x168] sm:$0xff] }
  0xf2   : > { %v2106_v19 = vrot.slane %v1999_v15, 2  ;;  %v583_v24 = vmul.f32 %v2944_v26, %v3529_v55  ;;  %v1956_v29 = vadd.f32 %v1861_v5, %v1712_v7  ;;  %v663_v25 = vmul.f32 %v2946_v27, %v3521_v3 }
  0xf3   : > { %v1957_v30 = vadd.f32 %v1863_v49, %v1713_v9  ;;  %v2105_v12 = vsel %vm965_vm4, %v2103_v16, %v2104_v11  ;;  %v664_v32 = vmul.f32 %v2946_v27, %v3529_v55  ;;  %v665_v52 = vmul.f32 %v2946_v27, %v3537_v0 }
  0xf4   : > { %v2107_v28 = vsel %vm965_vm4, %v2104_v11, %v2106_v19  ;;  %v908_v57 = vmul.f32 %v2954_v31, %v3521_v3  ;;  %v2200_v40 = vadd.f32 %v2105_v12, %v1956_v29  ;;  %v786_v51 = vrot.slane %v663_v25, 1 }
  0xf5   : > { %v2201_v22 = vadd.f32 %v2107_v28, %v1957_v30  ;;  %v909_v48 = vmul.f32 %v2954_v31, %v3529_v55  ;;  %v787_v62 = vrot.slane %v664_v32, 1  ;;  %v789_v38 = vrot.slane %v665_v52, 1  ;;  %v3805_v28 = vld [vmem:[#allocation2 + $0x178] sm:$0x3] }
  0xf6   : > { %v910_v47 = vmul.f32 %v2954_v31, %v3537_v0  ;;  %v1031_v50 = vrot.slane %v908_v57, 2  ;;  %v1140_v21 = vmul.f32 %v2962_v35, %v3657_v6  ;;  %v1141_v3 = vmul.f32 %v2962_v35, %v3663_v4 }
  0xf7   : > { %v2227_v53 = vpack.c.bf16 %v2201_v22, %v2200_v40  ;;  %v1032_v17 = vrot.slane %v909_v48, 2  ;;  %v788_v58 = vsel %vm720_vm3, %v786_v51, %v787_v62  ;;  %v790_v1 = vsel %vm720_vm3, %v787_v62, %v789_v38 }
  0xf8   : > { %v1034_v59 = vrot.slane %v910_v47, 2  ;;  %v1221_v55 = vmul.f32 %v2964_v36, %v3657_v6  ;;  %v859_v0 = vadd.f32 %v788_v58, %v582_v37  ;;  %v860_v60 = vadd.f32 %v790_v1, %v583_v24  ;;  %v3797_v37 = vld [vmem:[#allocation2 + $0x170] sm:$0xff] }
  0xf9   : > { %2694 = vmatmul.mubr.msk.bf16.gmra.mxu0 %vm365_vm1, %v2227_v53  ;;  %v1033_v61 = vsel %vm965_vm4, %v1031_v50, %v1032_v17  ;;  %v1222_v42 = vmul.f32 %v2964_v36, %v3663_v4  ;;  %v1223_v10 = vmul.f32 %v2964_v36, %v3667_v14  ;;  %v1465_v2 = vmul.f32 %v2972_v43, %v3657_v6 }
  0xfa   : > { %v1035_v8 = vsel %vm965_vm4, %v1032_v17, %v1034_v59  ;;  %v1343_v23 = vrot.slane %v1221_v55, 1  ;;  %v1104_v18 = vadd.f32 %v1033_v61, %v859_v0  ;;  %v1466_v15 = vmul.f32 %v2972_v43, %v3663_v4 }
  0xfb   : > { %v1105_v54 = vadd.f32 %v1035_v8, %v860_v60  ;;  %v1344_v13 = vrot.slane %v1222_v42, 1  ;;  %v1346_v16 = vrot.slane %v1223_v10, 1  ;;  %v1467_v7 = vmul.f32 %v2972_v43, %v3667_v14 }
  0xfc   : > { %v1587_v9 = vrot.slane %v1465_v2, 2  ;;  %v1696_v11 = vmul.f32 %v2974_v44, %v3789_v33  ;;  %v1172_v5 = vadd.f32 %v1140_v21, %v1104_v18  ;;  %v1588_v24 = vrot.slane %v1466_v15, 2 }
  0xfd   : > { %v1173_v49 = vadd.f32 %v1141_v3, %v1105_v54  ;;  %v1345_v19 = vsel %vm720_vm3, %v1343_v23, %v1344_v13  ;;  %v1347_v29 = vsel %vm720_vm3, %v1344_v13, %v1346_v16  ;;  %v1590_v30 = vrot.slane %v1467_v7, 2 }
  0xfe   : > { %v1697_v12 = vmul.f32 %v2974_v44, %v3797_v37  ;;  %v1777_v25 = vmul.f32 %v2976_v45, %v3789_v33  ;;  %v1416_v32 = vadd.f32 %v1345_v19, %v1172_v5  ;;  %v1589_v57 = vsel %vm965_vm4, %v1587_v9, %v1588_v24 }
  0xff   : > { %v1417_v52 = vadd.f32 %v1347_v29, %v1173_v49  ;;  %v1778_v40 = vmul.f32 %v2976_v45, %v3797_v37  ;;  %v1591_v22 = vsel %vm965_vm4, %v1588_v24, %v1590_v30  ;;  %v1779_v51 = vmul.f32 %v2976_v45, %v3805_v28 }
 0x100   : > { %v1899_v48 = vrot.slane %v1777_v25, 1  ;;  %v2021_v62 = vmul.f32 %v2978_v46, %v3789_v33  ;;  %v1660_v38 = vadd.f32 %v1589_v57, %v1416_v32  ;;  %v2022_v53 = vmul.f32 %v2978_v46, %v3797_v37 }
 0x101   : > { %v1661_v47 = vadd.f32 %v1591_v22, %v1417_v52  ;;  %v1900_v50 = vrot.slane %v1778_v40, 1  ;;  %v1902_v17 = vrot.slane %v1779_v51, 1  ;;  %v2023_v21 = vmul.f32 %v2978_v46, %v3805_v28 }
 0x102   : > { %v2143_v3 = vrot.slane %v2021_v62, 2  ;;  %v568_v58 = vmul.f32 %v2944_v26, %v3588_v63  ;;  %v1728_v1 = vadd.f32 %v1696_v11, %v1660_v38  ;;  %v2144_v0 = vrot.slane %v2022_v53, 2 }
 0x103   : > { %v1729_v59 = vadd.f32 %v1697_v12, %v1661_v47  ;;  %v1901_v55 = vsel %vm720_vm3, %v1899_v48, %v1900_v50  ;;  %v1903_v60 = vsel %vm720_vm3, %v1900_v50, %v1902_v17  ;;  %v2146_v61 = vrot.slane %v2023_v21, 2 }
 0x104   : > { %v569_v42 = vmul.f32 %v2944_v26, %v3596_v20  ;;  %v642_v8 = vmul.f32 %v2946_v27, %v3588_v63  ;;  %v1972_v10 = vadd.f32 %v1901_v55, %v1728_v1  ;;  %v2145_v2 = vsel %vm965_vm4, %v2143_v3, %v2144_v0 }
 0x105   : > { %v1973_v23 = vadd.f32 %v1903_v60, %v1729_v59  ;;  %v643_v18 = vmul.f32 %v2946_v27, %v3596_v20  ;;  %v2147_v54 = vsel %vm965_vm4, %v2144_v0, %v2146_v61  ;;  %v644_v13 = vmul.f32 %v2946_v27, %v3600_v34  ;;  %v3860_v59 = vld [vmem:[#allocation2 + $0xc0] sm:$0xff] }
 0x106   : > { %v751_v15 = vrot.slane %v642_v8, 1  ;;  %v887_v16 = vmul.f32 %v2954_v31, %v3588_v63  ;;  %v2216_v7 = vadd.f32 %v2145_v2, %v1972_v10  ;;  %v888_v5 = vmul.f32 %v2954_v31, %v3596_v20 }
 0x107   : > { %v2217_v9 = vadd.f32 %v2147_v54, %v1973_v23  ;;  %v752_v11 = vrot.slane %v643_v18, 1  ;;  %v754_v49 = vrot.slane %v644_v13, 1  ;;  %v889_v19 = vmul.f32 %v2954_v31, %v3600_v34  ;;  %v3866_v23 = vld [vmem:[#allocation2 + $0xc8] sm:$0xff] }
 0x108   : > { %v996_v24 = vrot.slane %v887_v16, 2  ;;  %v1126_v29 = vmul.f32 %v2962_v35, %v3724_v39  ;;  %v997_v25 = vrot.slane %v888_v5, 2  ;;  %v1127_v63 = vmul.f32 %v2962_v35, %v3728_v41  ;;  %v3875_v16 = vld [vmem:[#allocation2 + $0xd0] sm:$0x3] }
 0x109   : > { %v2235_v30 = vpack.c.bf16 %v2217_v9, %v2216_v7  ;;  %v753_v12 = vsel %vm720_vm3, %v751_v15, %v752_v11  ;;  %v755_v32 = vsel %vm720_vm3, %v752_v11, %v754_v49  ;;  %v999_v57 = vrot.slane %v889_v19, 2 }
 0x10a   : > { %v845_v52 = vadd.f32 %v753_v12, %v568_v58  ;;  %v1200_v20 = vmul.f32 %v2964_v36, %v3724_v39  ;;  %v846_v34 = vadd.f32 %v755_v32, %v569_v42  ;;  %v998_v40 = vsel %vm965_vm4, %v996_v24, %v997_v25 }
 0x10b   : > { %2710 = vmatmul.mubr.msk.bf16.gmra.mxu1 %vm365_vm1, %v2235_v30  ;;  %v1201_v22 = vmul.f32 %v2964_v36, %v3728_v41  ;;  %v1202_v51 = vmul.f32 %v2964_v36, %v3736_v56  ;;  %v1000_v48 = vsel %vm965_vm4, %v997_v25, %v999_v57  ;;  %v1444_v47 = vmul.f32 %v2972_v43, %v3724_v39 }
 0x10c   : > { %v1090_v62 = vadd.f32 %v998_v40, %v845_v52  ;;  %v1308_v38 = vrot.slane %v1200_v20, 1  ;;  %v1091_v50 = vadd.f32 %v1000_v48, %v846_v34  ;;  %v1445_v21 = vmul.f32 %v2972_v43, %v3728_v41 }
 0x10d   : > { %v1309_v53 = vrot.slane %v1201_v22, 1  ;;  %v1311_v17 = vrot.slane %v1202_v51, 1  ;;  %v1446_v58 = vmul.f32 %v2972_v43, %v3736_v56  ;;  %v1552_v1 = vrot.slane %v1444_v47, 2 }
 0x10e   : > { %v1158_v3 = vadd.f32 %v1126_v29, %v1090_v62  ;;  %v1682_v55 = vmul.f32 %v3860_v59, %v2974_v44  ;;  %v1159_v0 = vadd.f32 %v1127_v63, %v1091_v50  ;;  %v1553_v42 = vrot.slane %v1445_v21, 2 }
 0x10f   : > { %v1310_v60 = vsel %vm720_vm3, %v1308_v38, %v1309_v53  ;;  %v1312_v61 = vsel %vm720_vm3, %v1309_v53, %v1311_v17  ;;  %v1555_v10 = vrot.slane %v1446_v58, 2  ;;  %v1683_v2 = vmul.f32 %v3866_v23, %v2974_v44 }
 0x110   : > { %v1402_v8 = vadd.f32 %v1310_v60, %v1158_v3  ;;  %v1756_v18 = vmul.f32 %v3860_v59, %v2976_v45  ;;  %v1403_v54 = vadd.f32 %v1312_v61, %v1159_v0  ;;  %v1554_v13 = vsel %vm965_vm4, %v1552_v1, %v1553_v42 }
 0x111   : > { %v1757_v15 = vmul.f32 %v3866_v23, %v2976_v45  ;;  %v1758_v7 = vmul.f32 %v3875_v16, %v2976_v45  ;;  %v1556_v9 = vsel %vm965_vm4, %v1553_v42, %v1555_v10  ;;  %v2000_v49 = vmul.f32 %v3860_v59, %v2978_v46 }
 0x112   : > { %v1646_v11 = vadd.f32 %v1554_v13, %v1402_v8  ;;  %v1864_v5 = vrot.slane %v1756_v18, 1  ;;  %v1647_v19 = vadd.f32 %v1556_v9, %v1403_v54  ;;  %v2001_v30 = vmul.f32 %v3866_v23, %v2978_v46 }
 0x113   : > { %v1865_v24 = vrot.slane %v1757_v15, 1  ;;  %v1867_v29 = vrot.slane %v1758_v7, 1  ;;  %v2002_v25 = vmul.f32 %v3875_v16, %v2978_v46  ;;  %v2108_v63 = vrot.slane %v2000_v49, 2 }
 0x114   : > { %v1714_v12 = vadd.f32 %v1682_v55, %v1646_v11  ;;  %v584_v32 = vmul.f32 %v2944_v26, %v3657_v6  ;;  %v1715_v52 = vadd.f32 %v1683_v2, %v1647_v19  ;;  %v2109_v34 = vrot.slane %v2001_v30, 2 }
 0x115   : > { %v1866_v57 = vsel %vm720_vm3, %v1864_v5, %v1865_v24  ;;  %v1868_v20 = vsel %vm720_vm3, %v1865_v24, %v1867_v29  ;;  %v2111_v22 = vrot.slane %v2002_v25, 2  ;;  %v585_v51 = vmul.f32 %v2944_v26, %v3663_v4  ;;  %v3925_v29 = vld [vmem:[#allocation2 + $0x180] sm:$0xff] }
 0x116   : > { %v1958_v40 = vadd.f32 %v1866_v57, %v1714_v12  ;;  %v666_v48 = vmul.f32 %v2946_v27, %v3657_v6  ;;  %v1959_v62 = vadd.f32 %v1868_v20, %v1715_v52  ;;  %v2110_v38 = vsel %vm965_vm4, %v2108_v63, %v2109_v34 }
 0x117   : > { %v667_v47 = vmul.f32 %v2946_v27, %v3663_v4  ;;  %v668_v50 = vmul.f32 %v2946_v27, %v3667_v14  ;;  %v2112_v53 = vsel %vm965_vm4, %v2109_v34, %v2111_v22  ;;  %v911_v3 = vmul.f32 %v2954_v31, %v3657_v6  ;;  %v3931_v34 = vld [vmem:[#allocation2 + $0x188] sm:$0xff] }
 0x118   : > { %v2202_v17 = vadd.f32 %v2110_v38, %v1958_v40  ;;  %v791_v21 = vrot.slane %v666_v48, 1  ;;  %v2203_v58 = vadd.f32 %v2112_v53, %v1959_v62  ;;  %v912_v0 = vmul.f32 %v2954_v31, %v3663_v4  ;;  %v3935_v62 = vld [vmem:[#allocation2 + $0x190] sm:$0x3] }
 0x119   : > { %v792_v1 = vrot.slane %v667_v47, 1  ;;  %v794_v55 = vrot.slane %v668_v50, 1  ;;  %v913_v60 = vmul.f32 %v2954_v31, %v3667_v14  ;;  %v1036_v61 = vrot.slane %v911_v3, 2 }
 0x11a   : > { %v1142_v42 = vmul.f32 %v2962_v35, %v3789_v33  ;;  %v1143_v8 = vmul.f32 %v2962_v35, %v3797_v37  ;;  %v2228_v10 = vpack.c.bf16 %v2203_v58, %v2202_v17  ;;  %v1037_v18 = vrot.slane %v912_v0, 2 }
 0x11b   : > { %v793_v2 = vsel %vm720_vm3, %v791_v21, %v792_v1  ;;  %v795_v6 = vsel %vm720_vm3, %v792_v1, %v794_v55  ;;  %v1039_v15 = vrot.slane %v913_v60, 2  ;;  %v1224_v4 = vmul.f32 %v2964_v36, %v3789_v33 }
 0x11c   : > { %v861_v54 = vadd.f32 %v793_v2, %v584_v32  ;;  %v862_v13 = vadd.f32 %v795_v6, %v585_v51  ;;  %2697 = vmatprep.mubr.msk.bf16.mxu0 %vm365_vm1, %v2228_v10  ;;  %v1038_v14 = vsel %vm965_vm4, %v1036_v61, %v1037_v18  ;;  %v1225_v7 = vmul.f32 %v2964_v36, %v3797_v37 }
 0x11d   : > { %v1226_v9 = vmul.f32 %v2964_v36, %v3805_v28  ;;  %v1468_v11 = vmul.f32 %v2972_v43, %v3789_v33  ;;  %v1040_v5 = vsel %vm965_vm4, %v1037_v18, %v1039_v15  ;;  %v1348_v19 = vrot.slane %v1224_v4, 1 }
 0x11e   : > { %v1106_v49 = vadd.f32 %v1038_v14, %v861_v54  ;;  %v1469_v24 = vmul.f32 %v2972_v43, %v3797_v37  ;;  %v1107_v30 = vadd.f32 %v1040_v5, %v862_v13  ;;  %v1349_v12 = vrot.slane %v1225_v7, 1 }
 0x11f   : > { %v1351_v25 = vrot.slane %v1226_v9, 1  ;;  %v1470_v63 = vmul.f32 %v2972_v43, %v3805_v28  ;;  %v1592_v52 = vrot.slane %v1468_v11, 2  ;;  %v1698_v20 = vmul.f32 %v2974_v44, %v3925_v29 }
 0x120   : > { %v1174_v32 = vadd.f32 %v1142_v42, %v1106_v49  ;;  %v1593_v57 = vrot.slane %v1469_v24, 2  ;;  %v1175_v40 = vadd.f32 %v1143_v8, %v1107_v30  ;;  %v1350_v22 = vsel %vm720_vm3, %v1348_v19, %v1349_v12 }
 0x121   : > { %v1352_v51 = vsel %vm720_vm3, %v1349_v12, %v1351_v25  ;;  %v1595_v48 = vrot.slane %v1470_v63, 2  ;;  %v1699_v50 = vmul.f32 %v2974_v44, %v3931_v34  ;;  %v1780_v53 = vmul.f32 %v2976_v45, %v3925_v29 }
 0x122   : > { %v1418_v38 = vadd.f32 %v1350_v22, %v1174_v32  ;;  %v1594_v47 = vsel %vm965_vm4, %v1592_v52, %v1593_v57  ;;  %v1419_v17 = vadd.f32 %v1352_v51, %v1175_v40  ;;  %v1781_v3 = vmul.f32 %v2976_v45, %v3931_v34 }
 0x123   : > { %v1596_v21 = vsel %vm965_vm4, %v1593_v57, %v1595_v48  ;;  %v1782_v58 = vmul.f32 %v2976_v45, %v3935_v62  ;;  %v1904_v55 = vrot.slane %v1780_v53, 1  ;;  %v2024_v0 = vmul.f32 %v2978_v46, %v3925_v29 }
 0x124   : > { %v1662_v1 = vadd.f32 %v1594_v47, %v1418_v38  ;;  %v2025_v60 = vmul.f32 %v2978_v46, %v3931_v34  ;;  %v1663_v61 = vadd.f32 %v1596_v21, %v1419_v17  ;;  %v1905_v42 = vrot.slane %v1781_v3, 1 }
 0x125   : > { %v1907_v8 = vrot.slane %v1782_v58, 1  ;;  %v2026_v10 = vmul.f32 %v2978_v46, %v3935_v62  ;;  %v2148_v6 = vrot.slane %v2024_v0, 2  ;;  %v570_v54 = vmul.f32 %v2944_v26, %v3724_v39 }
 0x126   : > { %v1730_v2 = vadd.f32 %v1698_v20, %v1662_v1  ;;  %v2149_v18 = vrot.slane %v2025_v60, 2  ;;  %v1731_v13 = vadd.f32 %v1699_v50, %v1663_v61  ;;  %v1906_v15 = vsel %vm720_vm3, %v1904_v55, %v1905_v42 }
 0x127   : > { %v1908_v4 = vsel %vm720_vm3, %v1905_v42, %v1907_v8  ;;  %v2151_v14 = vrot.slane %v2026_v10, 2  ;;  %v571_v11 = vmul.f32 %v2944_v26, %v3728_v41  ;;  %v645_v5 = vmul.f32 %v2946_v27, %v3724_v39 }
 0x128   : > { %v1974_v7 = vadd.f32 %v1906_v15, %v1730_v2  ;;  %v2150_v9 = vsel %vm965_vm4, %v2148_v6, %v2149_v18  ;;  %v1975_v49 = vadd.f32 %v1908_v4, %v1731_v13  ;;  %v646_v24 = vmul.f32 %v2946_v27, %v3728_v41  ;;  %v2749_v15 = vld [vmem:[#allocation2 + $0xd8] sm:$0xff] }
 0x129   : > { %v2152_v19 = vsel %vm965_vm4, %v2149_v18, %v2151_v14  ;;  %v647_v30 = vmul.f32 %v2946_v27, %v3736_v56  ;;  %v756_v25 = vrot.slane %v645_v5, 1  ;;  %v890_v63 = vmul.f32 %v2954_v31, %v3724_v39 }
 0x12a   : > { %v2218_v12 = vadd.f32 %v2150_v9, %v1974_v7  ;;  %v891_v32 = vmul.f32 %v2954_v31, %v3728_v41  ;;  %v2219_v52 = vadd.f32 %v2152_v19, %v1975_v49  ;;  %v757_v57 = vrot.slane %v646_v24, 1  ;;  %v2750_v9 = vld [vmem:[#allocation2 + $0xe0] sm:$0xff] }
 0x12b   : > { %v759_v20 = vrot.slane %v647_v30, 1  ;;  %v892_v40 = vmul.f32 %v2954_v31, %v3736_v56  ;;  %v1001_v22 = vrot.slane %v890_v63, 2  ;;  %v1128_v48 = vmul.f32 %v3860_v59, %v2962_v35  ;;  %v2751_v30 = vld [vmem:[#allocation2 + $0xe8] sm:$0x3] }
 0x12c   : > { %v1002_v51 = vrot.slane %v891_v32, 2  ;;  %v1129_v38 = vmul.f32 %v3866_v23, %v2962_v35  ;;  %v2236_v47 = vpack.c.bf16 %v2219_v52, %v2218_v12  ;;  %v758_v39 = vsel %vm720_vm3, %v756_v25, %v757_v57 }
 0x12d   : > { %v760_v50 = vsel %vm720_vm3, %v757_v57, %v759_v20  ;;  %v1004_v41 = vrot.slane %v892_v40, 2  ;;  %v847_v53 = vadd.f32 %v758_v39, %v570_v54  ;;  %v1203_v56 = vmul.f32 %v3860_v59, %v2964_v36 }
 0x12e   : > { %v848_v17 = vadd.f32 %v760_v50, %v571_v11  ;;  %v1003_v21 = vsel %vm965_vm4, %v1001_v22, %v1002_v51  ;;  %2713 = vmatprep.mubr.msk.bf16.mxu1 %vm365_vm1, %v2236_v47  ;;  %v1204_v58 = vmul.f32 %v3866_v23, %v2964_v36  ;;  %v1205_v1 = vmul.f32 %v3875_v16, %v2964_v36 }
 0x12f   : > { %v1005_v3 = vsel %vm965_vm4, %v1002_v51, %v1004_v41  ;;  %v1447_v55 = vmul.f32 %v3860_v59, %v2972_v43  ;;  %v1092_v0 = vadd.f32 %v1003_v21, %v847_v53  ;;  %v1313_v61 = vrot.slane %v1203_v56, 1 }
 0x130   : > { %v1093_v60 = vadd.f32 %v1005_v3, %v848_v17  ;;  %v1448_v42 = vmul.f32 %v3866_v23, %v2972_v43  ;;  %v1314_v8 = vrot.slane %v1204_v58, 1  ;;  %v1316_v10 = vrot.slane %v1205_v1, 1 }
 0x131   : > { %v1449_v2 = vmul.f32 %v3875_v16, %v2972_v43  ;;  %v1557_v6 = vrot.slane %v1447_v55, 2  ;;  %v1160_v18 = vadd.f32 %v1128_v48, %v1092_v0  ;;  %v1684_v4 = vmul.f32 %v2749_v15, %v2974_v44 }
 0x132   : > { %v1161_v54 = vadd.f32 %v1129_v38, %v1093_v60  ;;  %v1558_v13 = vrot.slane %v1448_v42, 2  ;;  %v1315_v59 = vsel %vm720_vm3, %v1313_v61, %v1314_v8  ;;  %v1317_v14 = vsel %vm720_vm3, %v1314_v8, %v1316_v10 }
 0x133   : > { %v1560_v7 = vrot.slane %v1449_v2, 2  ;;  %v1685_v23 = vmul.f32 %v2750_v9, %v2974_v44  ;;  %v1404_v11 = vadd.f32 %v1315_v59, %v1160_v18  ;;  %v1759_v16 = vmul.f32 %v2749_v15, %v2976_v45 }
 0x134   : > { %v1405_v5 = vadd.f32 %v1317_v14, %v1161_v54  ;;  %v1559_v49 = vsel %vm965_vm4, %v1557_v6, %v1558_v13  ;;  %v1760_v24 = vmul.f32 %v2750_v9, %v2976_v45  ;;  %v1761_v12 = vmul.f32 %v2751_v30, %v2976_v45  ;;  %v2687_v14 = vpop.f32.mrf.mxu0 }
 0x135   : > { %v1561_v19 = vsel %vm965_vm4, %v1558_v13, %v1560_v7  ;;  %v2003_v25 = vmul.f32 %v2749_v15, %v2978_v46  ;;  %v1648_v63 = vadd.f32 %v1559_v49, %v1404_v11  ;;  %v1869_v52 = vrot.slane %v1759_v16, 1 }
 0x136   : > { %v1649_v32 = vadd.f32 %v1561_v19, %v1405_v5  ;;  %v2004_v57 = vmul.f32 %v2750_v9, %v2978_v46  ;;  %v1870_v20 = vrot.slane %v1760_v24, 1  ;;  %v1872_v40 = vrot.slane %v1761_v12, 1  ;;  %v547_v19 = vld [vmem:[#allocation2 + $0x1a0] sm:$0xff] }
 0x137   : > { %v2005_v22 = vmul.f32 %v2751_v30, %v2978_v46  ;;  %v2113_v51 = vrot.slane %v2003_v25, 2  ;;  %v1716_v48 = vadd.f32 %v1684_v4, %v1648_v63  ;;  %v586_v39 = vmul.f32 %v2944_v26, %v3789_v33 }
 0x138   : > { %v1717_v38 = vadd.f32 %v1685_v23, %v1649_v32  ;;  %v2114_v47 = vrot.slane %v2004_v57, 2  ;;  %v1871_v50 = vsel %vm720_vm3, %v1869_v52, %v1870_v20  ;;  %v1873_v41 = vsel %vm720_vm3, %v1870_v20, %v1872_v40  ;;  %v2332_v20 = vpop.f32.mrf.mxu0  ;;  %v548_v40 = vld [vmem:[#allocation2 + $0x1a8] sm:$0x3] }
 0x139   : > { %v2116_v53 = vrot.slane %v2005_v22, 2  ;;  %v587_v17 = vmul.f32 %v2944_v26, %v3797_v37  ;;  %v1960_v21 = vadd.f32 %v1871_v50, %v1716_v48  ;;  %v669_v58 = vmul.f32 %v2946_v27, %v3789_v33 }
 0x13a   : > { %v1961_v56 = vadd.f32 %v1873_v41, %v1717_v38  ;;  %v2115_v3 = vsel %vm965_vm4, %v2113_v51, %v2114_v47  ;;  %v670_v55 = vmul.f32 %v2946_v27, %v3797_v37  ;;  %v671_v0 = vmul.f32 %v2946_v27, %v3805_v28 }
 0x13b   : > { %v2117_v1 = vsel %vm965_vm4, %v2114_v47, %v2116_v53  ;;  %v914_v60 = vmul.f32 %v2954_v31, %v3789_v33  ;;  %v2204_v61 = vadd.f32 %v2115_v3, %v1960_v21  ;;  %v796_v42 = vrot.slane %v669_v58, 1  ;;  %v4057_v53 = vld [vmem:[%s4186_s5] ss:$0 sm:$0xff]  ;;  %v2688_v3 = vpop.f32.mrf.mxu0 }
 0x13c   : > { %v2205_v26 = vadd.f32 %v2117_v1, %v1961_v56  ;;  %v915_v8 = vmul.f32 %v2954_v31, %v3797_v37  ;;  %v797_v10 = vrot.slane %v670_v55, 1  ;;  %v799_v2 = vrot.slane %v671_v0, 1 }
 0x13d   : > { %v916_v6 = vmul.f32 %v2954_v31, %v3805_v28  ;;  %v1041_v18 = vrot.slane %v914_v60, 2  ;;  %v1144_v27 = vmul.f32 %v2962_v35, %v3925_v29  ;;  %v1145_v33 = vmul.f32 %v2962_v35, %v3931_v34  ;;  %v2703_v7 = vpop.f32.mrf.mxu1  ;;  %v546_v31 = vld [vmem:[#allocation2 + $0x198] sm:$0xff] }
 0x13e   : > { %v2229_v54 = vpack.c.bf16 %v2205_v26, %v2204_v61  ;;  %v1042_v13 = vrot.slane %v915_v8, 2  ;;  %v798_v15 = vsel %vm720_vm3, %v796_v42, %v797_v10  ;;  %v800_v4 = vsel %vm720_vm3, %v797_v10, %v799_v2 }
 0x13f   : > { %v1044_v59 = vrot.slane %v916_v6, 2  ;;  %v1227_v37 = vmul.f32 %v2964_v36, %v3925_v29  ;;  %v863_v28 = vadd.f32 %v798_v15, %v586_v39  ;;  %v864_v9 = vadd.f32 %v800_v4, %v587_v17 }
 0x140   : > { %2698 = vmatmul.mubr.msk.bf16.gmra.mxu0 %vm365_vm1, %v2229_v54  ;;  %v1043_v23 = vsel %vm965_vm4, %v1041_v18, %v1042_v13  ;;  %v1228_v35 = vmul.f32 %v2964_v36, %v3931_v34  ;;  %v1229_v5 = vmul.f32 %v2964_v36, %v3935_v62  ;;  %v1471_v16 = vmul.f32 %v2972_v43, %v3925_v29  ;;  %v2396_v36 = vpop.f32.mrf.mxu1 }
 0x141   : > { %v1045_v11 = vsel %vm965_vm4, %v1042_v13, %v1044_v59  ;;  %v1353_v49 = vrot.slane %v1227_v37, 1  ;;  %v1108_v24 = vadd.f32 %v1043_v23, %v863_v28  ;;  %v1472_v25 = vmul.f32 %v2972_v43, %v3931_v34 }
 0x142   : > { %v1109_v30 = vadd.f32 %v1045_v11, %v864_v9  ;;  %v1354_v12 = vrot.slane %v1228_v35, 1  ;;  %v1356_v63 = vrot.slane %v1229_v5, 1  ;;  %v1473_v32 = vmul.f32 %v2972_v43, %v3935_v62  ;;  %v2704_v58 = vpop.f32.mrf.mxu1 }
 0x143   : > { %v1597_v52 = vrot.slane %v1471_v16, 2  ;;  %v1700_v57 = vmul.f32 %v2974_v44, %v546_v31  ;;  %v1176_v22 = vadd.f32 %v1144_v27, %v1108_v24  ;;  %v1598_v48 = vrot.slane %v1472_v25, 2  ;;  %v2335_v27 = vpop.f32.mrf.mxu0 }
 0x144   : > { %v1177_v51 = vadd.f32 %v1145_v33, %v1109_v30  ;;  %v1355_v29 = vsel %vm720_vm3, %v1353_v49, %v1354_v12  ;;  %v1357_v38 = vsel %vm720_vm3, %v1354_v12, %v1356_v63  ;;  %v1600_v47 = vrot.slane %v1473_v32, 2  ;;  %v2399_v33 = vpop.f32.mrf.mxu1 }
 0x145   : > { %v1701_v34 = vmul.f32 %v2974_v44, %v547_v19  ;;  %v1783_v39 = vmul.f32 %v2976_v45, %v546_v31  ;;  %v1420_v43 = vadd.f32 %v1355_v29, %v1176_v22  ;;  %v1599_v50 = vsel %vm965_vm4, %v1597_v52, %v1598_v48 }
 0x146   : > { %v1421_v62 = vadd.f32 %v1357_v38, %v1177_v51  ;;  %v1784_v41 = vmul.f32 %v2976_v45, %v547_v19  ;;  %v1601_v17 = vsel %vm965_vm4, %v1598_v48, %v1600_v47  ;;  %v1785_v21 = vmul.f32 %v2976_v45, %v548_v40 }
 0x147   : > { %v1909_v56 = vrot.slane %v1783_v39, 1  ;;  %v2027_v44 = vmul.f32 %v2978_v46, %v546_v31  ;;  %v1664_v1 = vadd.f32 %v1599_v50, %v1420_v43  ;;  %v2028_v60 = vmul.f32 %v2978_v46, %v547_v19 }
 0x148   : > { %v1665_v55 = vadd.f32 %v1601_v17, %v1421_v62  ;;  %v1910_v0 = vrot.slane %v1784_v41, 1  ;;  %v1912_v61 = vrot.slane %v1785_v21, 1  ;;  %v2029_v26 = vmul.f32 %v2978_v46, %v548_v40 }
 0x149   : > { %v2153_v45 = vrot.slane %v2027_v44, 2  ;;  %v2341_v42 = vadd.f32 %v2687_v14, %v4057_v53  ;;  %v1732_v8 = vadd.f32 %v1700_v57, %v1664_v1  ;;  %v2154_v6 = vrot.slane %v2028_v60, 2 }
 0x14a   : > { %v1733_v10 = vadd.f32 %v1701_v34, %v1665_v55  ;;  %v1911_v2 = vsel %vm720_vm3, %v1909_v56, %v1910_v0  ;;  %v1913_v18 = vsel %vm720_vm3, %v1910_v0, %v1912_v61  ;;  %v2156_v54 = vrot.slane %v2029_v26, 2 }
 0x14b   : > { %v2405_v13 = vadd.f32 %v2703_v7, %v4057_v53  ;;  %v1976_v46 = vadd.f32 %v1911_v2, %v1732_v8  ;;  %v2155_v4 = vsel %vm965_vm4, %v2153_v45, %v2154_v6  ;;  %2462 = vst.msk [vmem:[%s4068_s29 + $0x10] sm:$0xff] %vm2459_vm5, %v2341_v42  ;;  %v2333_v59 = vadd.f32 %v4057_v53, %v2332_v20 }
 0x14c   : > { %v1977_v15 = vadd.f32 %v1913_v18, %v1733_v10  ;;  %v2157_v37 = vsel %vm965_vm4, %v2154_v6, %v2156_v54  ;;  %v2397_v14 = vadd.f32 %v4057_v53, %v2396_v36  ;;  %v2344_v7 = vadd.f32 %v2688_v3, %v4057_v53 }
 0x14d   : > { %2478 = vst.msk [vmem:[%s4068_s29 + $0x90] sm:$0xff] %vm2459_vm5, %v2405_v13  ;;  %v2408_v31 = vadd.f32 %v2704_v58, %v4057_v53  ;;  %v2220_v28 = vadd.f32 %v2155_v4, %v1976_v46  ;;  %2460 = vst.msk [vmem:[%s4068_s29] sm:$0xff] %vm2459_vm5, %v2333_v59  ;;  %v2336_v23 = vadd.f32 %v4057_v53, %v2335_v27 }
 0x14e   : > { %v2221_v9 = vadd.f32 %v2157_v37, %v1977_v15  ;;  %v2400_v35 = vadd.f32 %v4057_v53, %v2399_v33  ;;  %2476 = vst.msk [vmem:[%s4068_s29 + $0x80] sm:$0xff] %vm2459_vm5, %v2397_v14  ;;  %2463 = vst.msk [vmem:[%s4068_s29 + $0x18] sm:$0xff] %vm2459_vm5, %v2344_v7 }
 0x14f   : > { %2479 = vst.msk [vmem:[%s4068_s29 + $0x98] sm:$0xff] %vm2459_vm5, %v2408_v31  ;;  %2461 = vst.msk [vmem:[%s4068_s29 + $0x8] sm:$0xff] %vm2459_vm5, %v2336_v23 }
 0x150   : > { %v2237_v11 = vpack.c.bf16 %v2221_v9, %v2220_v28  ;;  %2477 = vst.msk [vmem:[%s4068_s29 + $0x88] sm:$0xff] %vm2459_vm5, %v2400_v35 }
 0x152   : > { %2714 = vmatmul.mubr.msk.bf16.gmra.mxu1 %vm365_vm1, %v2237_v11 }
 0x172   : > { %v2691_v5 = vpop.f32.mrf.mxu0 }
 0x173   : > { %v2357_v49 = vadd.f32 %v2691_v5, %v4057_v53 }
 0x174   : > { %v2348_v16 = vpop.f32.mrf.mxu0 }
 0x175   : > { %2466 = vst.msk [vmem:[%s4068_s29 + $0x30] sm:$0xff] %vm2459_vm5, %v2357_v49  ;;  %v2349_v19 = vadd.f32 %v4057_v53, %v2348_v16 }
 0x176   : > { %v2692_v24 = vpop.f32.mrf.mxu0 }
 0x177   : > { %2464 = vst.msk [vmem:[%s4068_s29 + $0x20] sm:$0xff] %vm2459_vm5, %v2349_v19  ;;  %v2360_v30 = vadd.f32 %v2692_v24, %v4057_v53 }
 0x178   : > { %v2351_v12 = vpop.f32.mrf.mxu0 }
 0x179   : > { %2467 = vst.msk [vmem:[%s4068_s29 + $0x38] sm:$0xff] %vm2459_vm5, %v2360_v30  ;;  %v2352_v25 = vadd.f32 %v4057_v53, %v2351_v12 }
 0x17b   : > { %2465 = vst.msk [vmem:[%s4068_s29 + $0x28] sm:$0xff] %vm2459_vm5, %v2352_v25 }
 0x184   : > { %v2707_v63 = vpop.f32.mrf.mxu1 }
 0x185   : > { %v2421_v32 = vadd.f32 %v2707_v63, %v4057_v53 }
 0x186   : > { %v2412_v52 = vpop.f32.mrf.mxu1 }
 0x187   : > { %2482 = vst.msk [vmem:[%s4068_s29 + $0xb0] sm:$0xff] %vm2459_vm5, %v2421_v32  ;;  %v2413_v57 = vadd.f32 %v4057_v53, %v2412_v52 }
 0x188   : > { %v2708_v20 = vpop.f32.mrf.mxu1 }
 0x189   : > { %2480 = vst.msk [vmem:[%s4068_s29 + $0xa0] sm:$0xff] %vm2459_vm5, %v2413_v57  ;;  %v2424_v36 = vadd.f32 %v2708_v20, %v4057_v53 }
 0x18a   : > { %v2415_v40 = vpop.f32.mrf.mxu1 }
 0x18b   : > { %2483 = vst.msk [vmem:[%s4068_s29 + $0xb8] sm:$0xff] %vm2459_vm5, %v2424_v36  ;;  %v2416_v22 = vadd.f32 %v4057_v53, %v2415_v40 }
 0x18d   : > { %2481 = vst.msk [vmem:[%s4068_s29 + $0xa8] sm:$0xff] %vm2459_vm5, %v2416_v22 }
 0x1b9   : > { %v2695_v51 = vpop.f32.mrf.mxu0 }
 0x1ba   : > { %v2373_v29 = vadd.f32 %v2695_v51, %v4057_v53 }
 0x1bb   : > { %v2364_v48 = vpop.f32.mrf.mxu0 }
 0x1bc   : > { %2470 = vst.msk [vmem:[%s4068_s29 + $0x50] sm:$0xff] %vm2459_vm5, %v2373_v29  ;;  %v2365_v38 = vadd.f32 %v4057_v53, %v2364_v48 }
 0x1bd   : > { %v2696_v47 = vpop.f32.mrf.mxu0 }
 0x1be   : > { %2468 = vst.msk [vmem:[%s4068_s29 + $0x40] sm:$0xff] %vm2459_vm5, %v2365_v38  ;;  %v2376_v34 = vadd.f32 %v2696_v47, %v4057_v53 }
 0x1bf   : > { %v2367_v39 = vpop.f32.mrf.mxu0 }
 0x1c0   : > { %2471 = vst.msk [vmem:[%s4068_s29 + $0x58] sm:$0xff] %vm2459_vm5, %v2376_v34  ;;  %v2368_v43 = vadd.f32 %v4057_v53, %v2367_v39 }
 0x1c2   : > { %2469 = vst.msk [vmem:[%s4068_s29 + $0x48] sm:$0xff] %vm2459_vm5, %v2368_v43 }
 0x1cb   : > { %v2711_v62 = vpop.f32.mrf.mxu1 }
 0x1cc   : > { %v2437_v50 = vadd.f32 %v2711_v62, %v4057_v53 }
 0x1cd   : > { %v2428_v41 = vpop.f32.mrf.mxu1 }
 0x1ce   : > { %2486 = vst.msk [vmem:[%s4068_s29 + $0xd0] sm:$0xff] %vm2459_vm5, %v2437_v50  ;;  %v2429_v17 = vadd.f32 %v4057_v53, %v2428_v41 }
 0x1cf   : > { %v2712_v21 = vpop.f32.mrf.mxu1 }
 0x1d0   : > { %2484 = vst.msk [vmem:[%s4068_s29 + $0xc0] sm:$0xff] %vm2459_vm5, %v2429_v17  ;;  %v2440_v56 = vadd.f32 %v2712_v21, %v4057_v53 }
 0x1d1   : > { %v2431_v44 = vpop.f32.mrf.mxu1 }
 0x1d2   : > { %2487 = vst.msk [vmem:[%s4068_s29 + $0xd8] sm:$0xff] %vm2459_vm5, %v2440_v56  ;;  %v2432_v3 = vadd.f32 %v4057_v53, %v2431_v44 }
 0x1d4   : > { %2485 = vst.msk [vmem:[%s4068_s29 + $0xc8] sm:$0xff] %vm2459_vm5, %v2432_v3 }
 0x200   : > { %v2699_v58 = vpop.f32.mrf.mxu0 }
 0x201   : > { %v2389_v1 = vadd.f32 %v2699_v58, %v4057_v53 }
 0x202   : > { %v2380_v55 = vpop.f32.mrf.mxu0 }
 0x203   : > { %2474 = vst.msk [vmem:[%s4068_s29 + $0x70] sm:$0xff] %vm2459_vm5, %v2389_v1  ;;  %v2381_v0 = vadd.f32 %v4057_v53, %v2380_v55 }
 0x204   : > { %v2700_v60 = vpop.f32.mrf.mxu0 }
 0x205   : > { %2472 = vst.msk [vmem:[%s4068_s29 + $0x60] sm:$0xff] %vm2459_vm5, %v2381_v0  ;;  %v2392_v61 = vadd.f32 %v2700_v60, %v4057_v53 }
 0x206   : > { %v2383_v26 = vpop.f32.mrf.mxu0 }
 0x207   : > { %2475 = vst.msk [vmem:[%s4068_s29 + $0x78] sm:$0xff] %vm2459_vm5, %v2392_v61  ;;  %v2384_v45 = vadd.f32 %v4057_v53, %v2383_v26 }
 0x209   : > { %2473 = vst.msk [vmem:[%s4068_s29 + $0x68] sm:$0xff] %vm2459_vm5, %v2384_v45 }
 0x212   : > { %v2715_v42 = vpop.f32.mrf.mxu1 }
 0x213   : > { %v2453_v8 = vadd.f32 %v2715_v42, %v4057_v53 }
 0x214   : > { %v2444_v10 = vpop.f32.mrf.mxu1 }
 0x215   : > { %2490 = vst.msk [vmem:[%s4068_s29 + $0xf0] sm:$0xff] %vm2459_vm5, %v2453_v8  ;;  %v2445_v2 = vadd.f32 %v4057_v53, %v2444_v10 }
 0x216   : > { %v2716_v6 = vpop.f32.mrf.mxu1 }
 0x217   : > { %2488 = vst.msk [vmem:[%s4068_s29 + $0xe0] sm:$0xff] %vm2459_vm5, %v2445_v2  ;;  %v2456_v18 = vadd.f32 %v2716_v6, %v4057_v53 }
 0x218   : > { %v2447_v54 = vpop.f32.mrf.mxu1 }
 0x219   : > { %2491 = vst.msk [vmem:[%s4068_s29 + $0xf8] sm:$0xff] %vm2459_vm5, %v2456_v18  ;;  %v2448_v13 = vadd.f32 %v4057_v53, %v2447_v54 }
 0x21b   : > { %2489 = vst.msk [vmem:[%s4068_s29 + $0xe8] sm:$0xff] %vm2459_vm5, %v2448_v13 }
 0x21c PF: > { %s16_s23 = sadd.s32 1, %s2774_s23   ;;  %s4188_s21 = smov %s2770_s22 }
 0x21d   : > { %p13_p5 = scmp.ge.s32.totalorder %s16_s23, 4   ;;  %s4189_s22 = smov %s4191_s24 }
 0x21f   :  { %15 = sbr.rel (!%p13_p5) target bundleno = 2 (0x2), region = 82 }

</bundles_post_ra>
